<compile_context>
chip_gen: v7x
topology: tpu7x:2x2x1
jax: 0.10.0
libtpu: 0.0.40
codegen_flags: <defaults>
</compile_context>

<pallas_src>
import functools
import math

import jax
import jax.numpy as jnp
from jax.experimental import pallas as pl
from jax.experimental.pallas import tpu as pltpu
import numpy as np


def _round_up(v, m):
    return ((v + m - 1) // m) * m


def _elementwise_dtype():
    """bf16 for the VALU-bound arccos/mask chain on chips with a bf16 VALU
    (v6e / v7x); f32 otherwise (v5e and older have no bf16 VALU)."""
    try:
        kind = jax.devices()[0].device_kind.lower()
    except Exception:
        return jnp.float32
    if ("v6" in kind) or ("v7" in kind) or ("7x" in kind):
        return jnp.bfloat16
    return jnp.float32


# ---------------------------------------------------------------------------
# Fused kernel: cosine gram -> Aij -> masked adjacency -> D^-1/2 A D^-1/2
#               -> message passing -> linear layer, all resident in VMEM.
# ---------------------------------------------------------------------------
def fused_gcn_kernel(x_ref, seg_row_ref, seg_col_ref, pos_row_ref, pos_col_ref,
                     wt_ref, b_ref, o_ref, *, elem_dtype):
    x = x_ref[...]                                      # [Np, Fp] f32
    F = x.shape[1]
    O = wt_ref.shape[1]                                 # padded out_feats

    # ---- pairwise cosine similarity: f32 gram, explicit HIGHEST precision
    #      (arccos is sensitive near +-1; do not let the MXU silently use a
    #      single low-precision pass) ----
    sq = jnp.sum(x * x, axis=-1, keepdims=True)         # [Np, 1]
    inv = jnp.where(sq > 0.0, jax.lax.rsqrt(sq), 0.0)   # EUP rsqrt; 0-norm -> 0
    xn = x * inv
    cos = jax.lax.dot_general(                          # xn @ xn.T
        xn, xn, (((1,), (1,)), ((), ())),
        precision=jax.lax.Precision.HIGHEST,
        preferred_element_type=jnp.float32)             # [Np, Np] f32
    cos = jnp.clip(cos, -1.0, 1.0)

    # ---- Aij = 1 - arccos(cos)/pi  (Abramowitz & Stegun 4.4.45 polynomial,
    #      |err| < 7e-5 rad in f32).  Chain runs in `elem_dtype` (bf16 on
    #      v6e/v7x): adj feeds the MXU in bf16 right after, so downstream
    #      precision is unchanged while the VALU-bound stage runs ~2x faster.
    ax = jnp.abs(cos)                                   # f32
    root = jnp.sqrt(jnp.maximum(1.0 - ax, 0.0)).astype(elem_dtype)   # EUP sqrt
    ax = ax.astype(elem_dtype)
    poly = ((-0.0187293 * ax + 0.0742610) * ax - 0.2121144) * ax + 1.5707288
    acos_pos = root * poly
    acos = jnp.where(cos < 0.0, jnp.pi - acos_pos, acos_pos)
    aij = 1.0 - acos * (1.0 / jnp.pi)                   # [Np, Np] elem_dtype

    # ---- same-dialogue mask; diagonal forced to exactly 1 (matches the
    #      reference's eye) with two selects ----
    same = seg_col_ref[...] == seg_row_ref[...]         # [Np,1]==[1,Np]
    diag = pos_col_ref[...] == pos_row_ref[...]
    adj = jnp.where(same, aij, 0.0)
    adj = jnp.where(diag, 1.0, adj)                     # elem_dtype

    # ---- symmetric normalisation folded into vector scalings ----
    d = jnp.sum(adj, axis=1, keepdims=True, dtype=jnp.float32)   # >= 1 (diag)
    s = jax.lax.rsqrt(d)                                # D^-1/2 as [Np,1] f32

    # ---- matmul chain (bf16 MXU operands, f32 accumulation) ----
    adj_bf = adj.astype(jnp.bfloat16)
    w_bf = wt_ref[...]                                  # already bf16
    # Reassociate adj @ (x @ W^T) when it does not cost extra 128-lane MXU
    # passes (static, trace-time decision).
    if -(-O // 128) <= -(-F // 128):
        xw = jnp.dot(x.astype(jnp.bfloat16), w_bf,
                     preferred_element_type=jnp.float32)          # [Np, O]
        h = jnp.dot(adj_bf, (s * xw).astype(jnp.bfloat16),
                    preferred_element_type=jnp.float32)           # [Np, O]
        y = s * h
    else:
        h = jnp.dot(adj_bf, (s * x).astype(jnp.bfloat16),
                    preferred_element_type=jnp.float32)           # [Np, F]
        y = jnp.dot((s * h).astype(jnp.bfloat16), w_bf,
                    preferred_element_type=jnp.float32)           # [Np, O]

    o_ref[...] = y + b_ref[...]                         # bias epilogue, f32


# ---------------------------------------------------------------------------
# Wrapper
# ---------------------------------------------------------------------------
def gcn_layer1_forward(inputs, dia_len, topicLabel, weight, bias):
    """inputs: [N, in_feats] f32; dia_len: python list of ints (sum == N);
    topicLabel unused (use_topic=False); weight: [out, in]; bias: [out]."""
    del topicLabel  # use_topic = False
    N, in_feats = inputs.shape
    out_feats = weight.shape[0]
    assert sum(dia_len) == N

    Np = _round_up(N, 128)           # lane-dense node dim (and K of A @ xw)
    Fp = _round_up(in_feats, 128)    # lane-dense feature / contraction dim
    Op = _round_up(out_feats, 128)   # lane-dense output width

    # Padded operands (zero rows/cols contribute nothing and are sliced off;
    # padded nodes get unique segment ids so they stay isolated).
    x_p = jnp.pad(inputs.astype(jnp.float32),
                  ((0, Np - N), (0, Fp - in_feats)))              # [Np, Fp] f32
    wt_p = jnp.pad(jnp.transpose(weight).astype(jnp.bfloat16),
                   ((0, Fp - in_feats), (0, Op - out_feats)))     # [Fp, Op] bf16
    b_p = jnp.pad(bias.astype(jnp.float32),
                  (0, Op - out_feats)).reshape(1, Op)             # [1, Op] f32

    n_dia = len(dia_len)
    seg_np = np.concatenate([
        np.repeat(np.arange(n_dia, dtype=np.int32), np.asarray(dia_len)),
        np.arange(n_dia, n_dia + (Np - N), dtype=np.int32),       # pad: unique
    ]).astype(np.int32)
    pos_np = np.arange(Np, dtype=np.int32)
    seg_row = jnp.asarray(seg_np).reshape(1, Np)
    seg_col = jnp.asarray(seg_np).reshape(Np, 1)
    pos_row = jnp.asarray(pos_np).reshape(1, Np)
    pos_col = jnp.asarray(pos_np).reshape(Np, 1)

    elem_dtype = _elementwise_dtype()
    elem_bytes = jnp.dtype(elem_dtype).itemsize

    # VMEM budget estimate: operands/outputs + resident NxN intermediates
    # (cos + temporaries + bf16 matmul copy), with 2x headroom.
    nxn = Np * Np
    est = (x_p.size * 4 + wt_p.size * 2 + b_p.size * 4 + 4 * Np * 4
           + Np * Op * 4 * 3
           + nxn * (4 * 3 + elem_bytes * 4 + 2))
    vmem_limit = int(min(max(2 * est, 16 * 1024 * 1024), 127 * 1024 * 1024))

    flops = 2 * Np * Np * Fp + 2 * Np * Np * Op + 2 * Np * Fp * Op
    transcendentals = Np * Np + 2 * Np      # sqrt per pair + rsqrt per node
    bytes_accessed = (x_p.size * 4 + wt_p.size * 2 + b_p.size * 4
                      + 4 * Np * 4 + Np * Op * 4)

    vmem = pl.BlockSpec(memory_space=pltpu.MemorySpace.VMEM)
    out = pl.pallas_call(
        functools.partial(fused_gcn_kernel, elem_dtype=elem_dtype),
        out_shape=jax.ShapeDtypeStruct((Np, Op), jnp.float32),
        in_specs=[vmem] * 7,
        out_specs=vmem,
        compiler_params=pltpu.CompilerParams(vmem_limit_bytes=vmem_limit),
        cost_estimate=pl.CostEstimate(flops=flops,
                                      transcendentals=transcendentals,
                                      bytes_accessed=bytes_accessed),
    )(x_p, seg_row, seg_col, pos_row, pos_col, wt_p, b_p)

    return out[:N, :out_feats]


# ---------------------------------------------------------------------------
# Pure-JAX f32 reference (same math as the PyTorch module, vectorised)
# ---------------------------------------------------------------------------
def gcn_layer1_reference(inputs, dia_len, weight, bias):
    N = inputs.shape[0]
    seg = np.repeat(np.arange(len(dia_len)), np.asarray(dia_len))
    same = (seg[:, None] == seg[None, :]) & ~np.eye(N, dtype=bool)
    x = inputs.astype(jnp.float32)
    norm = jnp.sqrt(jnp.sum(x * x, axis=-1))
    denom = norm[:, None] * norm[None, :]
    cos = jnp.where(denom > 0.0, (x @ x.T) / jnp.maximum(denom, 1e-30), 0.0)
    cos = jnp.clip(cos, -1.0, 1.0)
    aij = 1.0 - jnp.arccos(cos) / jnp.pi
    adj = jnp.where(jnp.asarray(same), aij, 0.0) + jnp.eye(N, dtype=jnp.float32)
    d = jnp.sum(adj, axis=1)
    Dm = jnp.diag(d ** -0.5)
    adjn = Dm @ adj @ Dm
    return adjn @ x @ weight.T + bias


if __name__ == "__main__":
    key = jax.random.PRNGKey(0)
    k_x, k_w, k_b = jax.random.split(key, 3)

    dia_len = [6, 10]                 # two dialogues, 16 utterance nodes total
    N = sum(dia_len)
    in_feats, out_feats = 64, 32

    inputs = jax.random.normal(k_x, (N, in_feats), dtype=jnp.float32)
    topicLabel = None                 # unused (use_topic=False)

    # nn.Linear default init: U(-1/sqrt(in), 1/sqrt(in)) for weight and bias
    bound = 1.0 / math.sqrt(in_feats)
    weight = jax.random.uniform(k_w, (out_feats, in_feats), jnp.float32,
                                minval=-bound, maxval=bound)
    bias = jax.random.uniform(k_b, (out_feats,), jnp.float32,
                              minval=-bound, maxval=bound)

    out = gcn_layer1_forward(inputs, dia_len, topicLabel, weight, bias)
    jax.block_until_ready(out)

    ref = gcn_layer1_reference(inputs, dia_len, weight, bias)
    err = float(jnp.max(jnp.abs(out - ref)))

    assert out.shape == (N, out_feats)
    assert bool(jnp.all(jnp.isfinite(out)))
    # bf16 matmul operands + arccos polynomial (bf16 on v6e/v7x) -> small,
    # bounded drift vs the f32 reference.
    assert err < 1e-1, f"max abs err vs f32 reference = {err}"
    print("KERNEL_OK")
</pallas_src>

<mosaic_0001>
module attributes {stable_mosaic.version = 11 : i64} {
  func.func @fused_gcn_kernel(%arg0: memref<128x128xf32, #tpu.memory_space<vmem>>, %arg1: memref<1x128xi32, #tpu.memory_space<vmem>>, %arg2: memref<128x1xi32, #tpu.memory_space<vmem>>, %arg3: memref<1x128xi32, #tpu.memory_space<vmem>>, %arg4: memref<128x1xi32, #tpu.memory_space<vmem>>, %arg5: memref<128x128xbf16, #tpu.memory_space<vmem>>, %arg6: memref<1x128xf32, #tpu.memory_space<vmem>>, %arg7: memref<128x128xf32, #tpu.memory_space<vmem>>) attributes {dimension_semantics = [], scalar_prefetch = 0 : i64, scratch_operands = 0 : i64, tpu.core_type = #tpu.core_type<tc>} {
    %c0 = arith.constant 0 : index
    %c0_0 = arith.constant 0 : index
    %0 = vector.load %arg0[%c0, %c0_0] : memref<128x128xf32, #tpu.memory_space<vmem>>, vector<128x128xf32>
    %1 = arith.mulf %0, %0 : vector<128x128xf32>
    %cst = arith.constant dense<0.000000e+00> : vector<128xf32>
    %2 = vector.multi_reduction <add>, %1, %cst [1] : vector<128x128xf32> to vector<128xf32>
    %3 = vector.shape_cast %2 : vector<128xf32> to vector<128x1xf32>
    %cst_1 = arith.constant 0.000000e+00 : f32
    %4 = vector.broadcast %cst_1 : f32 to vector<128x1xf32>
    %5 = arith.cmpf ogt, %3, %4 : vector<128x1xf32>
    %6 = math.rsqrt %3 : vector<128x1xf32>
    %cst_2 = arith.constant 0.000000e+00 : f32
    %7 = vector.broadcast %cst_2 : f32 to vector<128x1xf32>
    %8 = arith.select %5, %6, %7 : vector<128x1xi1>, vector<128x1xf32>
    %9 = vector.broadcast %8 : vector<128x1xf32> to vector<128x128xf32>
    %10 = arith.mulf %0, %9 : vector<128x128xf32>
    %cst_3 = arith.constant dense<0.000000e+00> : vector<128x128xf32>
    %11 = tpu.matmul %10, %10, %cst_3 {dimension_numbers = #tpu.dot_dimension_numbers<[1], [1], [0], [0], [0, 0, 1, 0], [], []>, precision = #tpu.contract_precision<fp32>} : vector<128x128xf32>, vector<128x128xf32>, vector<128x128xf32> -> vector<128x128xf32>
    %cst_4 = arith.constant -1.000000e+00 : f32
    %cst_5 = arith.constant 1.000000e+00 : f32
    %12 = vector.broadcast %cst_4 : f32 to vector<128x128xf32>
    %13 = arith.maximumf %12, %11 : vector<128x128xf32>
    %14 = vector.broadcast %cst_5 : f32 to vector<128x128xf32>
    %15 = arith.minimumf %14, %13 : vector<128x128xf32>
    %16 = math.absf %15 : vector<128x128xf32>
    %cst_6 = arith.constant 1.000000e+00 : f32
    %17 = vector.broadcast %cst_6 : f32 to vector<128x128xf32>
    %18 = arith.subf %17, %16 : vector<128x128xf32>
    %cst_7 = arith.constant 0.000000e+00 : f32
    %19 = vector.broadcast %cst_7 : f32 to vector<128x128xf32>
    %20 = arith.maximumf %18, %19 : vector<128x128xf32>
    %21 = math.sqrt %20 : vector<128x128xf32>
    %cst_8 = arith.constant -1.872930e-02 : f32
    %22 = vector.broadcast %cst_8 : f32 to vector<128x128xf32>
    %23 = arith.mulf %22, %16 : vector<128x128xf32>
    %cst_9 = arith.constant 7.426100e-02 : f32
    %24 = vector.broadcast %cst_9 : f32 to vector<128x128xf32>
    %25 = arith.addf %23, %24 : vector<128x128xf32>
    %26 = arith.mulf %25, %16 : vector<128x128xf32>
    %cst_10 = arith.constant 0.212114394 : f32
    %27 = vector.broadcast %cst_10 : f32 to vector<128x128xf32>
    %28 = arith.subf %26, %27 : vector<128x128xf32>
    %29 = arith.mulf %28, %16 : vector<128x128xf32>
    %cst_11 = arith.constant 1.57072878 : f32
    %30 = vector.broadcast %cst_11 : f32 to vector<128x128xf32>
    %31 = arith.addf %29, %30 : vector<128x128xf32>
    %32 = arith.mulf %21, %31 : vector<128x128xf32>
    %cst_12 = arith.constant 0.000000e+00 : f32
    %33 = vector.broadcast %cst_12 : f32 to vector<128x128xf32>
    %34 = arith.cmpf olt, %15, %33 : vector<128x128xf32>
    %cst_13 = arith.constant 3.14159274 : f32
    %35 = vector.broadcast %cst_13 : f32 to vector<128x128xf32>
    %36 = arith.subf %35, %32 : vector<128x128xf32>
    %37 = arith.select %34, %36, %32 : vector<128x128xi1>, vector<128x128xf32>
    %cst_14 = arith.constant 0.318309873 : f32
    %38 = vector.broadcast %cst_14 : f32 to vector<128x128xf32>
    %39 = arith.mulf %37, %38 : vector<128x128xf32>
    %cst_15 = arith.constant 1.000000e+00 : f32
    %40 = vector.broadcast %cst_15 : f32 to vector<128x128xf32>
    %41 = arith.subf %40, %39 : vector<128x128xf32>
    %c0_16 = arith.constant 0 : index
    %c0_17 = arith.constant 0 : index
    %42 = vector.load %arg2[%c0_16, %c0_17] : memref<128x1xi32, #tpu.memory_space<vmem>>, vector<128x1xi32>
    %c0_18 = arith.constant 0 : index
    %c0_19 = arith.constant 0 : index
    %43 = vector.load %arg1[%c0_18, %c0_19] : memref<1x128xi32, #tpu.memory_space<vmem>>, vector<1x128xi32>
    %44 = vector.broadcast %42 : vector<128x1xi32> to vector<128x128xi32>
    %45 = vector.broadcast %43 : vector<1x128xi32> to vector<128x128xi32>
    %46 = arith.cmpi eq, %44, %45 : vector<128x128xi32>
    %c0_20 = arith.constant 0 : index
    %c0_21 = arith.constant 0 : index
    %47 = vector.load %arg4[%c0_20, %c0_21] : memref<128x1xi32, #tpu.memory_space<vmem>>, vector<128x1xi32>
    %c0_22 = arith.constant 0 : index
    %c0_23 = arith.constant 0 : index
    %48 = vector.load %arg3[%c0_22, %c0_23] : memref<1x128xi32, #tpu.memory_space<vmem>>, vector<1x128xi32>
    %49 = vector.broadcast %47 : vector<128x1xi32> to vector<128x128xi32>
    %50 = vector.broadcast %48 : vector<1x128xi32> to vector<128x128xi32>
    %51 = arith.cmpi eq, %49, %50 : vector<128x128xi32>
    %cst_24 = arith.constant 0.000000e+00 : f32
    %52 = vector.broadcast %cst_24 : f32 to vector<128x128xf32>
    %53 = arith.select %46, %41, %52 : vector<128x128xi1>, vector<128x128xf32>
    %cst_25 = arith.constant 1.000000e+00 : f32
    %54 = vector.broadcast %cst_25 : f32 to vector<128x128xf32>
    %55 = arith.select %51, %54, %53 : vector<128x128xi1>, vector<128x128xf32>
    %cst_26 = arith.constant dense<0.000000e+00> : vector<128xf32>
    %56 = vector.multi_reduction <add>, %55, %cst_26 [1] : vector<128x128xf32> to vector<128xf32>
    %57 = vector.shape_cast %56 : vector<128xf32> to vector<128x1xf32>
    %58 = math.rsqrt %57 : vector<128x1xf32>
    %59 = arith.truncf %55 : vector<128x128xf32> to vector<128x128xbf16>
    %c0_27 = arith.constant 0 : index
    %c0_28 = arith.constant 0 : index
    %60 = vector.load %arg5[%c0_27, %c0_28] : memref<128x128xbf16, #tpu.memory_space<vmem>>, vector<128x128xbf16>
    %61 = arith.truncf %0 : vector<128x128xf32> to vector<128x128xbf16>
    %cst_29 = arith.constant dense<0.000000e+00> : vector<128x128xf32>
    %62 = tpu.matmul %61, %60, %cst_29 {dimension_numbers = #tpu.dot_dimension_numbers<[1], [0], [0], [1], [0, 0, 1, 1], [], []>} : vector<128x128xbf16>, vector<128x128xbf16>, vector<128x128xf32> -> vector<128x128xf32>
    %63 = vector.broadcast %58 : vector<128x1xf32> to vector<128x128xf32>
    %64 = arith.mulf %63, %62 : vector<128x128xf32>
    %65 = arith.truncf %64 : vector<128x128xf32> to vector<128x128xbf16>
    %cst_30 = arith.constant dense<0.000000e+00> : vector<128x128xf32>
    %66 = tpu.matmul %59, %65, %cst_30 {dimension_numbers = #tpu.dot_dimension_numbers<[1], [0], [0], [1], [0, 0, 1, 1], [], []>} : vector<128x128xbf16>, vector<128x128xbf16>, vector<128x128xf32> -> vector<128x128xf32>
    %67 = vector.broadcast %58 : vector<128x1xf32> to vector<128x128xf32>
    %68 = arith.mulf %67, %66 : vector<128x128xf32>
    %c0_31 = arith.constant 0 : index
    %c0_32 = arith.constant 0 : index
    %69 = vector.load %arg6[%c0_31, %c0_32] : memref<1x128xf32, #tpu.memory_space<vmem>>, vector<1x128xf32>
    %70 = vector.broadcast %69 : vector<1x128xf32> to vector<128x128xf32>
    %71 = arith.addf %68, %70 : vector<128x128xf32>
    %c0_33 = arith.constant 0 : index
    %c0_34 = arith.constant 0 : index
    %72 = vector.load %arg7[%c0_33, %c0_34] : memref<128x128xf32, #tpu.memory_space<vmem>>, vector<128x128xf32>
    tpu.vector_store %arg7[%c0_33, %c0_34], %71 {strides = array<i32>} : memref<128x128xf32, #tpu.memory_space<vmem>>, vector<128x128xf32>,
    return
  }
}

</mosaic_0001>

<bundles_post_ra>
// kernel: tpu_custom_call.1
= control target key start
LH: loop header
LB: loop body
LE: loop exit
PB: predicated region body
PF: predicated region fallthrough
CT: control target
= control target key end

     0   :  { %s5201_s0 = inlined_call_operand.vmem [shape: f32[128,128], index: 0, kind: input, shape index: {}]   ;;  %s5202_s1 = inlined_call_operand.vmem [shape: s32[1,128], index: 1, kind: input, shape index: {}]   ;;  %s5203_s2 = inlined_call_operand.vmem [shape: s32[128,1], index: 2, kind: input, shape index: {}]   ;;  %s5204_s3 = inlined_call_operand.vmem [shape: s32[1,128], index: 3, kind: input, shape index: {}]   ;;  %s5205_s4 = inlined_call_operand.vmem [shape: s32[128,1], index: 4, kind: input, shape index: {}]   ;;  %s5206_s5 = inlined_call_operand.vmem [shape: bf16[128,128], index: 5, kind: input, shape index: {}]   ;;  %s5207_s6 = inlined_call_operand.vmem [shape: f32[1,128], index: 6, kind: input, shape index: {}]   ;;  %s5208_s7 = inlined_call_operand.hbm [shape: f32[128,128], index: 7, kind: output, shape index: {}]  }
   0x1   :  { %v3580_v0 = vld [vmem:[%s5201_s0 + $0x10] sm:$0xff]  ;;  %v3585_v1 = vld [vmem:[%s5201_s0] sm:$0xff]  ;;  %v3590_v2 = vld [vmem:[%s5201_s0 + $0x18] sm:$0xff] }
   0x2   :  { %v46_v3 = vmul.f32 %v3580_v0, %v3580_v0  ;;  %v44_v4 = vmul.f32 %v3585_v1, %v3585_v1  ;;  %v3599_v5 = vld [vmem:[%s5201_s0 + $0x8] sm:$0xff]  ;;  %v47_v6 = vmul.f32 %v3590_v2, %v3590_v2  ;;  %v3613_v9 = vld [vmem:[%s5201_s0 + $0x20] sm:$0xff]  ;;  %v3618_v10 = vld [vmem:[%s5201_s0 + $0x38] sm:$0xff] }
   0x3   :  { %v45_v7 = vmul.f32 %v3599_v5, %v3599_v5  ;;  %v3608_v8 = vld [vmem:[%s5201_s0 + $0x28] sm:$0xff]  ;;  %v3623_v11 = vld [vmem:[%s5201_s0 + $0x30] sm:$0xff]  ;;  %v48_v13 = vmul.f32 %v3613_v9, %v3613_v9 }
   0x4   :  { %64 = vadd.xlane.f32.xlu1 %v46_v3  ;;  %60 = vadd.xlane.f32.xlu0 %v44_v4  ;;  %v49_v12 = vmul.f32 %v3608_v8, %v3608_v8 }
   0x8   :  { %66 = vadd.xlane.f32.xlu1 %v47_v6  ;;  %62 = vadd.xlane.f32.xlu0 %v45_v7 }
   0x9   :  { %12 = vsyncpa [#allocation3], 0  ;;  %v51_v14 = vmul.f32 %v3618_v10, %v3618_v10  ;;  %v50_v15 = vmul.f32 %v3623_v11, %v3623_v11  ;;  %v3636_v16 = vld [vmem:[%s5201_s0 + $0x48] sm:$0xff]  ;;  %v3641_v17 = vld [vmem:[%s5201_s0 + $0x40] sm:$0xff] }
   0xa   :  { %v53_v18 = vmul.f32 %v3636_v16, %v3636_v16  ;;  %v52_v19 = vmul.f32 %v3641_v17, %v3641_v17  ;;  %v3650_v20 = vld [vmem:[%s5201_s0 + $0x58] sm:$0xff]  ;;  %v3655_v21 = vld [vmem:[%s5201_s0 + $0x50] sm:$0xff]  ;;  %v3664_v24 = vld [vmem:[%s5201_s0 + $0x68] sm:$0xff] }
   0xb   :  { %v55_v22 = vmul.f32 %v3650_v20, %v3650_v20  ;;  %v54_v23 = vmul.f32 %v3655_v21, %v3655_v21  ;;  %v3669_v25 = vld [vmem:[%s5201_s0 + $0x60] sm:$0xff]  ;;  %v57_v26 = vmul.f32 %v3664_v24, %v3664_v24  ;;  %v3678_v28 = vld [vmem:[%s5201_s0 + $0x78] sm:$0xff]  ;;  %v3683_v29 = vld [vmem:[%s5201_s0 + $0x70] sm:$0xff] }
   0xc   :  { %70 = vadd.xlane.f32.xlu1 %v49_v12  ;;  %68 = vadd.xlane.f32.xlu0 %v48_v13  ;;  %v56_v27 = vmul.f32 %v3669_v25, %v3669_v25  ;;  %v59_v30 = vmul.f32 %v3678_v28, %v3678_v28  ;;  %v58_v31 = vmul.f32 %v3683_v29, %v3683_v29 }
  0x10   :  { %74 = vadd.xlane.f32.xlu1 %v51_v14  ;;  %72 = vadd.xlane.f32.xlu0 %v50_v15 }
  0x14   :  { %78 = vadd.xlane.f32.xlu1 %v53_v18  ;;  %76 = vadd.xlane.f32.xlu0 %v52_v19 }
  0x18   :  { %82 = vadd.xlane.f32.xlu1 %v55_v22  ;;  %80 = vadd.xlane.f32.xlu0 %v54_v23 }
  0x1c   :  { %86 = vadd.xlane.f32.xlu1 %v57_v26  ;;  %84 = vadd.xlane.f32.xlu0 %v56_v27 }
  0x20   :  { %90 = vadd.xlane.f32.xlu1 %v59_v30  ;;  %88 = vadd.xlane.f32.xlu0 %v58_v31 }
  0x91   :  { %v65_v32 = vpop.xlane.xlu1 %64  ;;  %v61_v33 = vpop.xlane.xlu0 %60 }
  0x92   :  { %3398 = vrsqrt.f32 %v65_v32  ;;  %vm92_vm0 = vcmp.gt.f32.partialorder %v61_v33, 0.0  ;;  %vm94_vm1 = vcmp.gt.f32.partialorder %v65_v32, 0.0 }
  0x93   :  { %3400 = vrsqrt.f32 %v61_v33 }
  0x95   :  { %v67_v34 = vpop.xlane.xlu1 %66  ;;  %v63_v35 = vpop.xlane.xlu0 %62 }
  0x96   :  { %3402 = vrsqrt.f32 %v67_v34  ;;  %vm95_vm2 = vcmp.gt.f32.partialorder %v67_v34, 0.0  ;;  %vm93_vm3 = vcmp.gt.f32.partialorder %v63_v35, 0.0 }
  0x97   :  { %3404 = vrsqrt.f32 %v63_v35 }
  0x99   :  { %v71_v36 = vpop.xlane.xlu1 %70  ;;  %v69_v37 = vpop.xlane.xlu0 %68 }
  0x9a   :  { %3406 = vrsqrt.f32 %v71_v36  ;;  %vm97_vm4 = vcmp.gt.f32.partialorder %v71_v36, 0.0  ;;  %vm96_vm5 = vcmp.gt.f32.partialorder %v69_v37, 0.0 }
  0x9b   :  { %3408 = vrsqrt.f32 %v69_v37 }
  0x9c   :  { %v3399_v38 = vpop.eup %3398 }
  0x9d   :  { %v3401_v39 = vpop.eup %3400  ;;  %v75_v41 = vpop.xlane.xlu1 %74  ;;  %v126_v42 = vsel %vm94_vm1, %v3399_v38, 0.0 }
  0x9e   :  { %v124_v40 = vsel %vm92_vm0, %v3401_v39, 0.0  ;;  %v73_v44 = vpop.xlane.xlu0 %72  ;;  %3410 = vrsqrt.f32 %v75_v41  ;;  %v142_v49 = vmul.f32 %v126_v42, %v3580_v0  ;;  %vm99_vm6 = vcmp.gt.f32.partialorder %v75_v41, 0.0 }
  0x9f   :  { %v140_v43 = vmul.f32 %v124_v40, %v3585_v1  ;;  %3412 = vrsqrt.f32 %v73_v44  ;;  %vm98_vm7 = vcmp.gt.f32.partialorder %v73_v44, 0.0 }
  0xa0   :  { %v3403_v45 = vpop.eup %3402  ;;  %v3702_v60 = vand.u32 4294901760, %v142_v49 }
  0xa1   :  { %v3405_v46 = vpop.eup %3404  ;;  %v3690_v47 = vand.u32 4294901760, %v140_v43  ;;  %v127_v48 = vsel %vm95_vm2, %v3403_v45, 0.0  ;;  %v79_v62 = vpop.xlane.xlu1 %78 }
  0xa2   :  { %v143_v50 = vmul.f32 %v127_v48, %v3590_v2  ;;  %v125_v51 = vsel %vm93_vm3, %v3405_v46, 0.0  ;;  %v77_v0 = vpop.xlane.xlu0 %76  ;;  %3414 = vrsqrt.f32 %v79_v62  ;;  %v3725_v13 = vsub.f32 %v142_v49, %v3702_v60 }
  0xa3   :  { %v238_v52 = vsub.f32 %v140_v43, %v3690_v47  ;;  %v141_v53 = vmul.f32 %v125_v51, %v3599_v5  ;;  %3416 = vrsqrt.f32 %v77_v0  ;;  %vm101_vm8 = vcmp.gt.f32.partialorder %v79_v62, 0.0 }
  0xa4   :  { %v3407_v54 = vpop.eup %3406  ;;  %v3696_v55 = vand.u32 4294901760, %v143_v50  ;;  %vm100_vm9 = vcmp.gt.f32.partialorder %v77_v0, 0.0 }
  0xa5   :  { %v3409_v56 = vpop.eup %3408  ;;  %v3698_v57 = vand.u32 4294901760, %v141_v53  ;;  %v129_v58 = vsel %vm97_vm4, %v3407_v54, 0.0  ;;  %2856 = vmatprep.mubr.f32.mxu0 %v238_v52  ;;  %v3700_v59 = vand.u32 4294901760, %v238_v52  ;;  %v83_v23 = vpop.xlane.xlu1 %82 }
  0xa6   :  { %v128_v61 = vsel %vm96_vm5, %v3409_v56, 0.0  ;;  %v3713_v3 = vsub.f32 %v143_v50, %v3696_v55  ;;  %v145_v4 = vmul.f32 %v129_v58, %v3608_v8  ;;  %v3720_v7 = vpack.c.bf16 %v3696_v55, %v3702_v60  ;;  %v81_v27 = vpop.xlane.xlu0 %80 }
  0xa7   :  { %v3705_v63 = vsub.f32 %v141_v53, %v3698_v57  ;;  %v3709_v1 = vpack.c.bf16 %v3698_v57, %v3690_v47  ;;  %v240_v2 = vsub.f32 %v238_v52, %v3700_v59  ;;  %v144_v6 = vmul.f32 %v128_v61, %v3613_v9 }
  0xa8   :  { %v3411_v8 = vpop.eup %3410  ;;  %v3731_v15 = vand.u32 4294901760, %v145_v4  ;;  %v3180_v19 = vpack.c.bf16 %v3713_v3, %v3725_v13  ;;  %3418 = vrsqrt.f32 %v83_v23  ;;  %vm103_vm10 = vcmp.gt.f32.partialorder %v83_v23, 0.0 }
  0xa9   :  { %3113 = vmatprep.subr.bf16.mxu1 %v3709_v1  ;;  %v3722_v12 = vand.u32 4294901760, %v240_v2  ;;  %v3176_v14 = vpack.c.bf16 %v3705_v63, %v238_v52  ;;  %v3413_v9 = vpop.eup %3412  ;;  %v3733_v18 = vand.u32 4294901760, %v144_v6  ;;  %v131_v22 = vsel %vm99_vm6, %v3411_v8, 0.0  ;;  %v87_v39 = vpop.xlane.xlu1 %86 }
  0xaa   :  { %3115 = vmatpush3.bf16.xpose.msra.mxu1 %v3709_v1  ;;  %v130_v26 = vsel %vm98_vm7, %v3413_v9, 0.0  ;;  %v3738_v30 = vsub.f32 %v145_v4, %v3731_v15  ;;  %v147_v32 = vmul.f32 %v131_v22, %v3618_v10  ;;  %3420 = vrsqrt.f32 %v81_v27  ;;  %v85_v41 = vpop.xlane.xlu0 %84 }
  0xab   :  { %3117 = vmatprep.subr.bf16.mxu1 %v3720_v7  ;;  %2744 = vmatprep.mubr.f32.mxu1 %v3722_v12  ;;  %v3741_v31 = vsub.f32 %v144_v6, %v3733_v18  ;;  %v3746_v33 = vpack.c.bf16 %v3731_v15, %v3733_v18  ;;  %v146_v34 = vmul.f32 %v130_v26, %v3623_v11  ;;  %3422 = vrsqrt.f32 %v87_v39 }
  0xac   :  { %3177 = vmatprep.subr.bf16.mxu0 %v3176_v14  ;;  %v3415_v35 = vpop.eup %3414  ;;  %v3753_v10 = vand.u32 4294901760, %v147_v32  ;;  %3424 = vrsqrt.f32 %v85_v41  ;;  %vm102_vm11 = vcmp.gt.f32.partialorder %v81_v27, 0.0  ;;  %vm105_vm12 = vcmp.gt.f32.partialorder %v87_v39, 0.0 }
  0xad   :  { %3179 = vmatpush3.bf16.xpose.msra.mxu0 %v3176_v14  ;;  %v3417_v36 = vpop.eup %3416  ;;  %v3184_v37 = vpack.c.bf16 %v3738_v30, %v3741_v31  ;;  %v3755_v38 = vand.u32 4294901760, %v146_v34  ;;  %v133_v11 = vsel %vm101_vm8, %v3415_v35, 0.0  ;;  %v91_v51 = vpop.xlane.xlu1 %90  ;;  %vm104_vm13 = vcmp.gt.f32.partialorder %v85_v41, 0.0 }
  0xae   :  { %3181 = vmatprep.subr.bf16.mxu0 %v3180_v19  ;;  %v132_v40 = vsel %vm100_vm9, %v3417_v36, 0.0  ;;  %v3758_v42 = vsub.f32 %v147_v32, %v3753_v10  ;;  %v149_v45 = vmul.f32 %v133_v11, %v3636_v16  ;;  %v89_v16 = vpop.xlane.xlu0 %88  ;;  %3426 = vrsqrt.f32 %v91_v51 }
  0xaf   :  { %v3762_v43 = vpack.c.bf16 %v3753_v10, %v3755_v38  ;;  %v3765_v44 = vsub.f32 %v146_v34, %v3755_v38  ;;  %v148_v46 = vmul.f32 %v132_v40, %v3641_v17  ;;  %3428 = vrsqrt.f32 %v89_v16 }
  0xb0   :  { %v3773_v52 = vand.u32 4294901760, %v149_v45  ;;  %vm107_vm14 = vcmp.gt.f32.partialorder %v91_v51, 0.0  ;;  %vm106_vm15 = vcmp.gt.f32.partialorder %v89_v16, 0.0 }
  0xb1   :  { %v3188_v50 = vpack.c.bf16 %v3758_v42, %v3765_v44  ;;  %v3775_v53 = vand.u32 4294901760, %v148_v46 }
  0xb2   :  { %3119 = vmatpush3.bf16.xpose.msra.mxu1 %v3720_v7  ;;  %v3419_v48 = vpop.eup %3418  ;;  %v3782_v58 = vsub.f32 %v149_v45, %v3773_v52 }
  0xb3   :  { %3121 = vmatprep.subr.bf16.mxu1 %v3746_v33  ;;  %v135_v17 = vsel %vm103_vm10, %v3419_v48, 0.0  ;;  %v3779_v56 = vpack.c.bf16 %v3773_v52, %v3775_v53  ;;  %v3785_v61 = vsub.f32 %v148_v46, %v3775_v53  ;;  %v3834_v46 = vand.u32 4294901760, %v3705_v63 }
  0xb4   :  { %v3421_v49 = vpop.eup %3420  ;;  %v151_v62 = vmul.f32 %v135_v17, %v3650_v20 }
  0xb5   :  { %3183 = vmatpush3.bf16.xpose.msra.mxu0 %v3180_v19  ;;  %v134_v54 = vsel %vm102_vm11, %v3421_v49, 0.0  ;;  %v3423_v2 = vpop.eup %3422  ;;  %v3192_v6 = vpack.c.bf16 %v3782_v58, %v3785_v61 }
  0xb6   :  { %3185 = vmatprep.subr.bf16.mxu0 %v3184_v37  ;;  %v150_v0 = vmul.f32 %v134_v54, %v3655_v21  ;;  %v3425_v4 = vpop.eup %3424  ;;  %v3793_v14 = vand.u32 4294901760, %v151_v62  ;;  %v137_v20 = vsel %vm105_vm12, %v3423_v2, 0.0  ;;  %v3857_v54 = vand.u32 4294901760, %v3713_v3 }
  0xb7   :  { %v136_v9 = vsel %vm104_vm13, %v3425_v4, 0.0  ;;  %v153_v26 = vmul.f32 %v137_v20, %v3664_v24  ;;  %v3869_v20 = vand.u32 4294901760, %v3741_v31 }
  0xb8   :  { %v3795_v8 = vand.u32 4294901760, %v150_v0  ;;  %v3427_v19 = vpop.eup %3426  ;;  %v3802_v22 = vsub.f32 %v151_v62, %v3793_v14  ;;  %v152_v27 = vmul.f32 %v136_v9, %v3669_v25  ;;  %v3860_v62 = vand.u32 4294901760, %v3725_v13 }
  0xb9   :  { %v3429_v32 = vpop.eup %3428  ;;  %v3813_v35 = vand.u32 4294901760, %v153_v26  ;;  %v270_v2 = vsub.f32 %v3713_v3, %v3857_v54  ;;  %v3873_v9 = vand.u32 4294901760, %v3738_v30 }
  0xba   :  { %3123 = vmatpush3.bf16.xpose.msra.mxu1 %v3746_v33  ;;  %v3799_v21 = vpack.c.bf16 %v3793_v14, %v3795_v8  ;;  %v3805_v23 = vsub.f32 %v150_v0, %v3795_v8  ;;  %v3815_v36 = vand.u32 4294901760, %v152_v27  ;;  %v138_v24 = vsel %vm106_vm15, %v3429_v32, 0.0 }
  0xbb   :  { %3125 = vmatprep.subr.bf16.mxu1 %v3762_v43  ;;  %v3822_v39 = vsub.f32 %v153_v26, %v3813_v35  ;;  %v154_v41 = vmul.f32 %v138_v24, %v3683_v29  ;;  %v260_v4 = vsub.f32 %v3725_v13, %v3860_v62  ;;  %v280_v26 = vsub.f32 %v3741_v31, %v3869_v20 }
  0xbc   :  { %v3196_v34 = vpack.c.bf16 %v3802_v22, %v3805_v23  ;;  %v3819_v25 = vpack.c.bf16 %v3813_v35, %v3815_v36  ;;  %v3825_v11 = vsub.f32 %v152_v27, %v3815_v36  ;;  %v3878_v27 = vand.u32 4294901760, %v3765_v44 }
  0xbd   :  { %3187 = vmatpush3.bf16.xpose.msra.mxu0 %v3184_v37  ;;  %v139_v37 = vsel %vm107_vm14, %v3427_v19, 0.0  ;;  %v3838_v49 = vand.u32 4294901760, %v154_v41  ;;  %v290_v32 = vsub.f32 %v3738_v30, %v3873_v9 }
  0xbe   :  { %3189 = vmatprep.subr.bf16.mxu0 %v3188_v50  ;;  %v155_v40 = vmul.f32 %v139_v37, %v3678_v28  ;;  %v3200_v45 = vpack.c.bf16 %v3822_v39, %v3825_v11  ;;  %v250_v28 = vsub.f32 %v3705_v63, %v3834_v46  ;;  %v281_v37 = vand.u32 4294901760, %v280_v26 }
  0xbf   :  { %v3850_v51 = vsub.f32 %v154_v41, %v3838_v49  ;;  %v300_v24 = vsub.f32 %v3765_v44, %v3878_v27  ;;  %v291_v41 = vand.u32 4294901760, %v290_v32 }
  0xc0   :  { %v3836_v48 = vand.u32 4294901760, %v155_v40  ;;  %v251_v17 = vand.u32 4294901760, %v250_v28 }
  0xc1   :  { %v3930_v32 = vand.u32 4294901760, %v3850_v51 }
  0xc2   :  { %3127 = vmatpush3.bf16.xpose.msra.mxu1 %v3762_v43  ;;  %v3844_v29 = vpack.c.bf16 %v3836_v48, %v3838_v49  ;;  %v3144_v0 = vpack.c.bf16 %v251_v17, %v3722_v12  ;;  %v261_v12 = vand.u32 4294901760, %v260_v4 }
  0xc3   :  { %3129 = vmatprep.subr.bf16.mxu1 %v3779_v56 }
  0xc5   :  { %3191 = vmatpush3.bf16.xpose.msra.mxu0 %v3188_v50  ;;  %v3847_v50 = vsub.f32 %v155_v40, %v3836_v48  ;;  %v3891_v40 = vand.u32 4294901760, %v3785_v61 }
  0xc6   :  { %3193 = vmatprep.subr.bf16.mxu0 %v3192_v6 }
  0xc7   :  { %v3204_v16 = vpack.c.bf16 %v3847_v50, %v3850_v51  ;;  %v320_v28 = vsub.f32 %v3785_v61, %v3891_v40 }
  0xca   :  { %3131 = vmatpush3.bf16.xpose.msra.mxu1 %v3779_v56 }
  0xcb   :  { %3133 = vmatprep.subr.bf16.mxu1 %v3799_v21 }
  0xcd   :  { %3195 = vmatpush3.bf16.xpose.msra.mxu0 %v3192_v6  ;;  %v271_v6 = vand.u32 4294901760, %v270_v2  ;;  %v321_v2 = vand.u32 4294901760, %v320_v28 }
  0xce   :  { %3197 = vmatprep.subr.bf16.mxu0 %v3196_v34 }
  0xcf   :  { %v3148_v19 = vpack.c.bf16 %v271_v6, %v261_v12 }
  0xd2   :  { %3135 = vmatpush3.bf16.xpose.msra.mxu1 %v3799_v21 }
  0xd3   :  { %3137 = vmatprep.subr.bf16.mxu1 %v3819_v25 }
  0xd5   :  { %3199 = vmatpush3.bf16.xpose.msra.mxu0 %v3196_v34  ;;  %v3884_v34 = vand.u32 4294901760, %v3758_v42 }
  0xd6   :  { %3201 = vmatprep.subr.bf16.mxu0 %v3200_v45 }
  0xda   :  { %3139 = vmatpush3.bf16.xpose.msra.mxu1 %v3819_v25 }
  0xdb   :  { %3141 = vmatprep.subr.bf16.mxu1 %v3844_v29 }
  0xdd   :  { %3203 = vmatpush3.bf16.xpose.msra.mxu0 %v3200_v45  ;;  %v301_v45 = vand.u32 4294901760, %v300_v24 }
  0xde   :  { %3205 = vmatprep.subr.bf16.mxu0 %v3204_v16 }
  0xe2   :  { %3143 = vmatpush3.bf16.xpose.msra.mxu1 %v3844_v29 }
  0xe3   :  { %3145 = vmatprep.subr.bf16.mxu1 %v3144_v0 }
  0xe5   :  { %3207 = vmatpush3.bf16.xpose.msra.mxu0 %v3204_v16  ;;  %v3904_v16 = vand.u32 4294901760, %v3805_v23 }
  0xe6   :  { %3209 = vmatprep.subr.bf16.mxu0 %v3709_v1 }
  0xe7   :  { %v340_v4 = vsub.f32 %v3805_v23, %v3904_v16 }
  0xe9   :  { %2745 = vmatmul.mubr.f32.vlgmr.msra.gmra.mrb[0].mxu1 %v251_v17  ;;  %v3152_v17 = vpack.c.bf16 %v291_v41, %v281_v37 }
  0xea   :  { %2747 = vmatprep.mubr.f32.mxu1 %v261_v12  ;;  %3147 = vmatpush3.bf16.xpose.msra.mxu1 %v3144_v0 }
  0xeb   :  { %3149 = vmatprep.subr.bf16.mxu1 %v3148_v19 }
  0xec   :  { %2857 = vmatmul.mubr.f32.vlgmr.msra.gmra.mrb[0].mxu0 %v3705_v63  ;;  %v310_v63 = vsub.f32 %v3758_v42, %v3884_v34 }
  0xed   :  { %2859 = vmatprep.mubr.f32.mxu0 %v3725_v13  ;;  %3211 = vmatpush3.bf16.xpose.msra.mxu0 %v3709_v1  ;;  %v3898_v13 = vand.u32 4294901760, %v3782_v58 }
  0xee   :  { %2748 = vmatmul.mubr.f32.gmra.mrb[2].mxu1 %v271_v6  ;;  %3213 = vmatprep.subr.bf16.mxu0 %v3720_v7  ;;  %v3917_v6 = vand.u32 4294901760, %v3825_v11 }
  0xef   :  { %2750 = vmatprep.mubr.f32.mxu1 %v281_v37  ;;  %v330_v0 = vsub.f32 %v3782_v58, %v3898_v13 }
  0xf0   :  { %2860 = vmatmul.mubr.f32.gmra.mrb[2].mxu0 %v3713_v3  ;;  %v311_v3 = vand.u32 4294901760, %v310_v63  ;;  %v360_v26 = vsub.f32 %v3825_v11, %v3917_v6  ;;  %v380_v63 = vsub.f32 %v3850_v51, %v3930_v32 }
  0xf1   :  { %2862 = vmatprep.mubr.f32.mxu0 %v3741_v31  ;;  %v3910_v31 = vand.u32 4294901760, %v3802_v22 }
  0xf2   :  { %2751 = vmatmul.mubr.f32.gmra.mrb[4].mxu1 %v291_v41  ;;  %v3156_v37 = vpack.c.bf16 %v311_v3, %v301_v45  ;;  %v361_v41 = vand.u32 4294901760, %v360_v26  ;;  %v381_v28 = vand.u32 4294901760, %v380_v63  ;;  %v1833_v26 = vld [vmem:[%s5203_s2 + $0x38] sm:$0xff]  ;;  %v1920_v63 = vld [vmem:[%s5205_s4 + $0x48] sm:$0xff] }
  0xf3   :  { %2753 = vmatprep.mubr.f32.mxu1 %v301_v45  ;;  %3151 = vmatpush3.bf16.xpose.msra.mxu1 %v3148_v19  ;;  %v350_v12 = vsub.f32 %v3802_v22, %v3910_v31  ;;  %v341_v19 = vand.u32 4294901760, %v340_v4  ;;  %v3260_v4 = vpack.c.bf16 %v3910_v31, %v3904_v16 }
  0xf4   :  { %3153 = vmatprep.subr.bf16.mxu1 %v3152_v17  ;;  %2863 = vmatmul.mubr.f32.gmra.mrb[4].mxu0 %v3738_v30  ;;  %v331_v30 = vand.u32 4294901760, %v330_v0  ;;  %v1829_v0 = vld [vmem:[%s5203_s2 + $0x18] sm:$0xff] }
  0xf5   :  { %2865 = vmatprep.mubr.f32.mxu0 %v3765_v44  ;;  %3215 = vmatpush3.bf16.xpose.msra.mxu0 %v3720_v7  ;;  %v3924_v44 = vand.u32 4294901760, %v3822_v39 }
  0xf6   :  { %2754 = vmatmul.mubr.f32.gmra.mrb[6].mxu1 %v311_v3  ;;  %3217 = vmatprep.subr.bf16.mxu0 %v3746_v33  ;;  %v1827_v3 = vld [vmem:[%s5203_s2 + $0x8] sm:$0xff] }
  0xf7   :  { %2756 = vmatprep.mubr.f32.mxu1 %v321_v2  ;;  %v370_v24 = vsub.f32 %v3822_v39, %v3924_v44 }
  0xf8   :  { %2866 = vmatmul.mubr.f32.gmra.mrb[6].mxu0 %v3758_v42  ;;  %v351_v42 = vand.u32 4294901760, %v350_v12  ;;  %v1915_v12 = vld [vmem:[%s5205_s4 + $0x20] sm:$0xff] }
  0xf9   :  { %2868 = vmatprep.mubr.f32.mxu0 %v3785_v61  ;;  %v3936_v61 = vand.u32 4294901760, %v3847_v50 }
  0xfa   :  { %2757 = vmatmul.mubr.f32.gmra.mrb[8].mxu1 %v331_v30 }
  0xfb   :  { %2759 = vmatprep.mubr.f32.mxu1 %v341_v19  ;;  %3155 = vmatpush3.bf16.xpose.msra.mxu1 %v3152_v17  ;;  %v390_v45 = vsub.f32 %v3847_v50, %v3936_v61 }
  0xfc   :  { %3157 = vmatprep.subr.bf16.mxu1 %v3156_v37  ;;  %2869 = vmatmul.mubr.f32.gmra.mrb[8].mxu0 %v3782_v58  ;;  %v371_v58 = vand.u32 4294901760, %v370_v24  ;;  %v1835_v24 = vld [vmem:[%s5203_s2 + $0x48] sm:$0xff] }
  0xfd   :  { %2871 = vmatprep.mubr.f32.mxu0 %v3805_v23  ;;  %3219 = vmatpush3.bf16.xpose.msra.mxu0 %v3746_v33  ;;  %v3160_v23 = vpack.c.bf16 %v331_v30, %v321_v2  ;;  %v391_v17 = vand.u32 4294901760, %v390_v45  ;;  %v1914_v2 = vld [vmem:[%s5205_s4 + $0x18] sm:$0xff]  ;;  %v1831_v30 = vld [vmem:[%s5203_s2 + $0x28] sm:$0xff]  ;;  %v1838_v45 = vld [vmem:[%s5203_s2 + $0x60] sm:$0xff] }
  0xfe   :  { %2760 = vmatmul.mubr.f32.gmra.mrb[10].mxu1 %v351_v42  ;;  %3221 = vmatprep.subr.bf16.mxu0 %v3762_v43 }
  0xff   :  { %2762 = vmatprep.mubr.f32.mxu1 %v361_v41 }
 0x100   :  { %2872 = vmatmul.mubr.f32.gmra.mrb[10].mxu0 %v3802_v22  ;;  %v3164_v22 = vpack.c.bf16 %v351_v42, %v341_v19  ;;  %v1916_v19 = vld [vmem:[%s5205_s4 + $0x28] sm:$0xff]  ;;  %v1918_v42 = vld [vmem:[%s5205_s4 + $0x38] sm:$0xff] }
 0x101   :  { %2874 = vmatprep.mubr.f32.mxu0 %v3825_v11  ;;  %v3172_v11 = vpack.c.bf16 %v391_v17, %v381_v28 }
 0x102   :  { %2763 = vmatmul.mubr.f32.gmra.mrb[12].mxu1 %v371_v58 }
 0x103   :  { %2765 = vmatprep.mubr.f32.mxu1 %v381_v28  ;;  %3159 = vmatpush3.bf16.xpose.msra.mxu1 %v3156_v37  ;;  %v1917_v37 = vld [vmem:[%s5205_s4 + $0x30] sm:$0xff]  ;;  %v1923_v28 = vld [vmem:[%s5205_s4 + $0x60] sm:$0xff] }
 0x104   :  { %3161 = vmatprep.subr.bf16.mxu1 %v3160_v23  ;;  %2875 = vmatmul.mubr.f32.gmra.mrb[12].mxu0 %v3822_v39  ;;  %v3168_v39 = vpack.c.bf16 %v371_v58, %v361_v41  ;;  %v1919_v41 = vld [vmem:[%s5205_s4 + $0x40] sm:$0xff]  ;;  %v1921_v58 = vld [vmem:[%s5205_s4 + $0x50] sm:$0xff] }
 0x105   :  { %2877 = vmatprep.mubr.f32.mxu0 %v3850_v51  ;;  %3223 = vmatpush3.bf16.xpose.msra.mxu0 %v3762_v43  ;;  %v3244_v51 = vpack.c.bf16 %v3857_v54, %v3860_v62 }
 0x106   :  { %2766 = vmatmul.mubr.f32.gmra.mrb[14].mxu1 %v391_v17  ;;  %3225 = vmatprep.subr.bf16.mxu0 %v3779_v56  ;;  %v1839_v17 = vld [vmem:[%s5203_s2 + $0x68] sm:$0xff] }
 0x107   :  { %2800 = vmatprep.mubr.f32.mxu1 %v3690_v47 }
 0x108   :  { %2878 = vmatmul.mubr.f32.gmra.mrb[14].mxu0 %v3847_v50  ;;  %v3240_v50 = vpack.c.bf16 %v3834_v46, %v3700_v59 }
 0x109   :  { %2912 = vmatprep.mubr.f32.mxu0 %v3700_v59  ;;  %v3533_v59 = vmov 0  }
 0x10a   :  { %3389 = vset.pattern.permute.xlu1 %v3533_v59  ;;  %3388 = vset.pattern.permute.xlu0 %v3533_v59  ;;  %v3504_v59 = vld [vmem:[%s5201_s0 + $0x50] sm:$0xff] }
 0x10b   :  { %3163 = vmatpush3.bf16.xpose.msra.mxu1 %v3160_v23  ;;  %1847 = vperm.xlu1 %3389, %v1827_v3   ;;  %v1840_v23 = vld [vmem:[%s5203_s2 + $0x70] sm:$0xff] }
 0x10c   :  { %3165 = vmatprep.subr.bf16.mxu1 %v3164_v22 }
 0x10d   :  { %3227 = vmatpush3.bf16.xpose.msra.mxu0 %v3779_v56 }
 0x10e   :  { %3229 = vmatprep.subr.bf16.mxu0 %v3799_v21 }
 0x113   :  { %3167 = vmatpush3.bf16.xpose.msra.mxu1 %v3164_v22  ;;  %v1841_v22 = vld [vmem:[%s5203_s2 + $0x78] sm:$0xff] }
 0x114   :  { %3169 = vmatprep.subr.bf16.mxu1 %v3168_v39 }
 0x115   :  { %3231 = vmatpush3.bf16.xpose.msra.mxu0 %v3799_v21 }
 0x116   :  { %3233 = vmatprep.subr.bf16.mxu0 %v3819_v25 }
 0x11b   :  { %3171 = vmatpush3.bf16.xpose.msra.mxu1 %v3168_v39  ;;  %v3494_v39 = vld [vmem:[%s5201_s0] sm:$0xff] }
 0x11c   :  { %3173 = vmatprep.subr.bf16.mxu1 %v3172_v11 }
 0x11d   :  { %3235 = vmatpush3.bf16.xpose.msra.mxu0 %v3819_v25 }
 0x11e   :  { %3237 = vmatprep.subr.bf16.mxu0 %v3844_v29 }
 0x123   :  { %3175 = vmatpush3.bf16.xpose.msra.mxu1 %v3172_v11  ;;  %v3391_v11 = vld [vmem:[%s5206_s5 + $0x8] sm:$0xff]  }
 0x125   :  { %3239 = vmatpush3.bf16.xpose.msra.mxu0 %v3844_v29 }
 0x126   :  { %3241 = vmatprep.subr.bf16.mxu0 %v3240_v50 }
 0x12a   :  { %2801 = vmatmul.mubr.f32.vlgmr.msra.gmra.mrb[0].mxu1 %v3698_v57 }
 0x12b   :  { %2803 = vmatprep.mubr.f32.mxu1 %v3702_v60 }
 0x12c   :  { %2913 = vmatmul.mubr.f32.vlgmr.msra.gmra.mrb[0].mxu0 %v3834_v46  ;;  %v1911_v46 = vld [vmem:[%s5205_s4] sm:$0xff] }
 0x12d   :  { %2915 = vmatprep.mubr.f32.mxu0 %v3860_v62  ;;  %3243 = vmatpush3.bf16.xpose.msra.mxu0 %v3240_v50  ;;  %v3248_v62 = vpack.c.bf16 %v3873_v9, %v3869_v20  ;;  %v3395_v50 = vld [vmem:[%s5206_s5 + $0x28] sm:$0xff]  }
 0x12e   :  { %2804 = vmatmul.mubr.f32.gmra.mrb[2].mxu1 %v3696_v55  ;;  %3245 = vmatprep.subr.bf16.mxu0 %v3244_v51 }
 0x12f   :  { %2806 = vmatprep.mubr.f32.mxu1 %v3733_v18  ;;  %1929 = vperm.xlu1 %3389, %v1911_v46  }
 0x130   :  { %2916 = vmatmul.mubr.f32.gmra.mrb[2].mxu0 %v3857_v54  ;;  %v1912_v54 = vld [vmem:[%s5205_s4 + $0x8] sm:$0xff] }
 0x131   :  { %2918 = vmatprep.mubr.f32.mxu0 %v3869_v20  ;;  %v1828_v20 = vld [vmem:[%s5203_s2 + $0x10] sm:$0xff] }
 0x132   :  { %2807 = vmatmul.mubr.f32.gmra.mrb[4].mxu1 %v3731_v15 }
 0x133   :  { %2809 = vmatprep.mubr.f32.mxu1 %v3755_v38  ;;  %1932 = vperm.xlu1 %3389, %v1912_v54   ;;  %v3508_v54 = vld [vmem:[%s5201_s0 + $0x70] sm:$0xff] }
 0x134   :  { %2919 = vmatmul.mubr.f32.gmra.mrb[4].mxu0 %v3873_v9  ;;  %v3252_v9 = vpack.c.bf16 %v3884_v34, %v3878_v27 }
 0x135   :  { %2921 = vmatprep.mubr.f32.mxu0 %v3878_v27  ;;  %3247 = vmatpush3.bf16.xpose.msra.mxu0 %v3244_v51  ;;  %v1913_v27 = vld [vmem:[%s5205_s4 + $0x10] sm:$0xff]  ;;  %v3397_v51 = vld [vmem:[%s5206_s5 + $0x38] sm:$0xff]  }
 0x136   :  { %2810 = vmatmul.mubr.f32.gmra.mrb[6].mxu1 %v3753_v10  ;;  %3249 = vmatprep.subr.bf16.mxu0 %v3248_v62 }
 0x137   :  { %2812 = vmatprep.mubr.f32.mxu1 %v3775_v53  ;;  %1850 = vperm.xlu1 %3389, %v1828_v20  }
 0x138   :  { %2922 = vmatmul.mubr.f32.gmra.mrb[6].mxu0 %v3884_v34  ;;  %v3256_v34 = vpack.c.bf16 %v3898_v13, %v3891_v40 }
 0x139   :  { %2924 = vmatprep.mubr.f32.mxu0 %v3891_v40  ;;  %v1830_v40 = vld [vmem:[%s5203_s2 + $0x20] sm:$0xff] }
 0x13a   :  { %2813 = vmatmul.mubr.f32.gmra.mrb[8].mxu1 %v3773_v52 }
 0x13b   :  { %2815 = vmatprep.mubr.f32.mxu1 %v3795_v8  ;;  %1853 = vperm.xlu1 %3389, %v1829_v0  }
 0x13c   :  { %2925 = vmatmul.mubr.f32.gmra.mrb[8].mxu0 %v3898_v13  ;;  %v1826_v13 = vld [vmem:[%s5203_s2] sm:$0xff] }
 0x13d   :  { %2927 = vmatprep.mubr.f32.mxu0 %v3904_v16  ;;  %3251 = vmatpush3.bf16.xpose.msra.mxu0 %v3248_v62  ;;  %v1832_v16 = vld [vmem:[%s5203_s2 + $0x30] sm:$0xff]  ;;  %v3505_v62 = vld [vmem:[%s5201_s0 + $0x68] sm:$0xff] }
 0x13e   :  { %2816 = vmatmul.mubr.f32.gmra.mrb[10].mxu1 %v3793_v14  ;;  %3253 = vmatprep.subr.bf16.mxu0 %v3252_v9 }
 0x13f   :  { %2818 = vmatprep.mubr.f32.mxu1 %v3815_v36  ;;  %1935 = vperm.xlu1 %3389, %v1913_v27  }
 0x140   :  { %2928 = vmatmul.mubr.f32.gmra.mrb[10].mxu0 %v3910_v31  ;;  %1844 = vperm.xlu0 %3388, %v1826_v13   ;;  %v3264_v31 = vpack.c.bf16 %v3924_v44, %v3917_v6 }
 0x141   :  { %2930 = vmatprep.mubr.f32.mxu0 %v3917_v6  ;;  %v1834_v6 = vld [vmem:[%s5203_s2 + $0x40] sm:$0xff] }
 0x142   :  { %2819 = vmatmul.mubr.f32.gmra.mrb[12].mxu1 %v3813_v35 }
 0x143   :  { %2821 = vmatprep.mubr.f32.mxu1 %v3838_v49  ;;  %1938 = vperm.xlu1 %3389, %v1914_v2  }
 0x144   :  { %2931 = vmatmul.mubr.f32.gmra.mrb[12].mxu0 %v3924_v44  ;;  %1859 = vperm.xlu0 %3388, %v1831_v30   ;;  %v3268_v44 = vpack.c.bf16 %v3936_v61, %v3930_v32 }
 0x145   :  { %2933 = vmatprep.mubr.f32.mxu0 %v3930_v32  ;;  %3255 = vmatpush3.bf16.xpose.msra.mxu0 %v3252_v9  ;;  %v1836_v32 = vld [vmem:[%s5203_s2 + $0x50] sm:$0xff] }
 0x146   :  { %2822 = vmatmul.mubr.f32.gmra.mrb[14].mxu1 %v3836_v48  ;;  %3257 = vmatprep.subr.bf16.mxu0 %v3256_v34 }
 0x147   :  { %1856 = vperm.xlu1 %3389, %v1830_v40  }
 0x148   :  { %2934 = vmatmul.mubr.f32.gmra.mrb[14].mxu0 %v3936_v61  ;;  %1944 = vperm.xlu0 %3388, %v1916_v19   ;;  %v1837_v61 = vld [vmem:[%s5203_s2 + $0x58] sm:$0xff] }
 0x149   :  { %2968 = vmatprep.mubr.f32.mxu0 %v3690_v47 }
 0x14b   :  { %1941 = vperm.xlu1 %3389, %v1915_v12  }
 0x14c   :  { %1865 = vperm.xlu0 %3388, %v1833_v26  }
 0x14d   :  { %3259 = vmatpush3.bf16.xpose.msra.mxu0 %v3256_v34 }
 0x14e   :  { %3261 = vmatprep.subr.bf16.mxu0 %v3260_v4 }
 0x14f   :  { %1862 = vperm.xlu1 %3389, %v1832_v16  }
 0x150   :  { %1950 = vperm.xlu0 %3388, %v1918_v42  }
 0x153   :  { %1947 = vperm.xlu1 %3389, %v1917_v37  }
 0x154   :  { %1871 = vperm.xlu0 %3388, %v1835_v24  }
 0x155   :  { %3263 = vmatpush3.bf16.xpose.msra.mxu0 %v3260_v4 }
 0x156   :  { %3265 = vmatprep.subr.bf16.mxu0 %v3264_v31 }
 0x157   :  { %1868 = vperm.xlu1 %3389, %v1834_v6  }
 0x158   :  { %1956 = vperm.xlu0 %3388, %v1920_v63  }
 0x15b   :  { %1953 = vperm.xlu1 %3389, %v1919_v41  }
 0x15c   :  { %1877 = vperm.xlu0 %3388, %v1837_v61  }
 0x15d   :  { %3267 = vmatpush3.bf16.xpose.msra.mxu0 %v3264_v31 }
 0x15e   :  { %3269 = vmatprep.subr.bf16.mxu0 %v3268_v44 }
 0x15f   :  { %1874 = vperm.xlu1 %3389, %v1836_v32  }
 0x163   :  { %1959 = vperm.xlu1 %3389, %v1921_v58  }
 0x165   :  { %3271 = vmatpush3.bf16.xpose.msra.mxu0 %v3268_v44 }
 0x166   :  { %3273 = vmatprep.subr.bf16.mxu0 %v3709_v1 }
 0x167   :  { %1880 = vperm.xlu1 %3389, %v1838_v45  }
 0x16b   :  { %1965 = vperm.xlu1 %3389, %v1923_v28  }
 0x16c   :  { %2969 = vmatmul.mubr.f32.vlgmr.msra.gmra.mrb[0].mxu0 %v3698_v57 }
 0x16d   :  { %2971 = vmatprep.mubr.f32.mxu0 %v3702_v60  ;;  %3275 = vmatpush3.bf16.xpose.msra.mxu0 %v3709_v1  ;;  %v1925_v1 = vld [vmem:[%s5205_s4 + $0x70] sm:$0xff] }
 0x16e   :  { %3277 = vmatprep.subr.bf16.mxu0 %v3720_v7 }
 0x16f   :  { %1886 = vperm.xlu1 %3389, %v1840_v23  }
 0x170   :  { %2972 = vmatmul.mubr.f32.gmra.mrb[2].mxu0 %v3696_v55 }
 0x171   :  { %2974 = vmatprep.mubr.f32.mxu0 %v3733_v18 }
 0x173   :  { %1971 = vperm.xlu1 %3389, %v1925_v1  }
 0x174   :  { %2975 = vmatmul.mubr.f32.gmra.mrb[4].mxu0 %v3731_v15 }
 0x175   :  { %2977 = vmatprep.mubr.f32.mxu0 %v3755_v38  ;;  %3279 = vmatpush3.bf16.xpose.msra.mxu0 %v3720_v7  ;;  %v1922_v7 = vld [vmem:[%s5205_s4 + $0x58] sm:$0xff] }
 0x176   :  { %3281 = vmatprep.subr.bf16.mxu0 %v3746_v33  ;;  %1962 = vperm.xlu0 %3388, %v1922_v7  }
 0x178   :  { %2978 = vmatmul.mubr.f32.gmra.mrb[6].mxu0 %v3753_v10 }
 0x179   :  { %2980 = vmatprep.mubr.f32.mxu0 %v3775_v53 }
 0x17a   :  { %1883 = vperm.xlu0 %3388, %v1839_v17  }
 0x17c   :  { %2981 = vmatmul.mubr.f32.gmra.mrb[8].mxu0 %v3773_v52 }
 0x17d   :  { %2983 = vmatprep.mubr.f32.mxu0 %v3795_v8  ;;  %3283 = vmatpush3.bf16.xpose.msra.mxu0 %v3746_v33  ;;  %v1924_v33 = vld [vmem:[%s5205_s4 + $0x68] sm:$0xff] }
 0x17e   :  { %3285 = vmatprep.subr.bf16.mxu0 %v3762_v43  ;;  %1968 = vperm.xlu0 %3388, %v1924_v33  }
 0x180   :  { %2984 = vmatmul.mubr.f32.gmra.mrb[10].mxu0 %v3793_v14 }
 0x181   :  { %2986 = vmatprep.mubr.f32.mxu0 %v3815_v36 }
 0x182   :  { %1889 = vperm.xlu0 %3388, %v1841_v22  }
 0x184   :  { %2987 = vmatmul.mubr.f32.gmra.mrb[12].mxu0 %v3813_v35 }
 0x185   :  { %2989 = vmatprep.mubr.f32.mxu0 %v3838_v49  ;;  %3287 = vmatpush3.bf16.xpose.msra.mxu0 %v3762_v43  ;;  %v1926_v43 = vld [vmem:[%s5205_s4 + $0x78] sm:$0xff] }
 0x186   :  { %3289 = vmatprep.subr.bf16.mxu0 %v3779_v56  ;;  %1974 = vperm.xlu0 %3388, %v1926_v43  }
 0x188   :  { %2990 = vmatmul.mubr.f32.gmra.mrb[14].mxu0 %v3836_v48 }
 0x189   :  { %3024 = vmatprep.mubr.f32.mxu0 %v3690_v47  ;;  %v3390_v47 = vld [vmem:[%s5206_s5] sm:$0xff]  }
 0x18a   :  { %3048 = vmatprep.subr.bf16.mxu1 %v3390_v47  ;;  %v4239_v58 = vpop.permute.xlu1 %1847 }
 0x18b   :  { %3049 = vmatpush3.bf16.msra.mxu1 %v3390_v47 }
 0x18c   :  { %3050 = vmatprep.subr.bf16.mxu1 %v3391_v11 }
 0x18d   :  { %3291 = vmatpush3.bf16.xpose.msra.mxu0 %v3779_v56  ;;  %v2100_v56 = vpack.c.bf16 %v3599_v5, %v3494_v39  ;;  %v3393_v5 = vld [vmem:[%s5206_s5 + $0x18] sm:$0xff]  }
 0x18e   :  { %3293 = vmatprep.subr.bf16.mxu0 %v3799_v21 }
 0x18f   :  { %3064 = vmatprep.mubr.bf16.mxu1 %v2100_v56  ;;  %3051 = vmatpush3.bf16.msra.mxu1 %v3391_v11 }
 0x195   :  { %3295 = vmatpush3.bf16.xpose.msra.mxu0 %v3799_v21  ;;  %v3392_v21 = vld [vmem:[%s5206_s5 + $0x10] sm:$0xff]  }
 0x196   :  { %3297 = vmatprep.subr.bf16.mxu0 %v3819_v25  ;;  %3052 = vmatprep.subr.bf16.mxu1 %v3392_v21 }
 0x197   :  { %3053 = vmatpush3.bf16.msra.mxu1 %v3392_v21 }
 0x198   :  { %3054 = vmatprep.subr.bf16.mxu1 %v3393_v5 }
 0x19b   :  { %3055 = vmatpush3.bf16.msra.mxu1 %v3393_v5 }
 0x19d   :  { %3299 = vmatpush3.bf16.xpose.msra.mxu0 %v3819_v25  ;;  %v3394_v25 = vld [vmem:[%s5206_s5 + $0x20] sm:$0xff]  }
 0x19e   :  { %3301 = vmatprep.subr.bf16.mxu0 %v3844_v29  ;;  %3056 = vmatprep.subr.bf16.mxu1 %v3394_v25 }
 0x19f   :  { %3057 = vmatpush3.bf16.msra.mxu1 %v3394_v25 }
 0x1a0   :  { %3058 = vmatprep.subr.bf16.mxu1 %v3395_v50 }
 0x1a3   :  { %3059 = vmatpush3.bf16.msra.mxu1 %v3395_v50 }
 0x1a5   :  { %3303 = vmatpush3.bf16.xpose.msra.mxu0 %v3844_v29  ;;  %v3396_v29 = vld [vmem:[%s5206_s5 + $0x30] sm:$0xff]  }
 0x1a6   :  { %3060 = vmatprep.subr.bf16.mxu1 %v3396_v29 }
 0x1a7   :  { %3061 = vmatpush3.bf16.msra.mxu1 %v3396_v29 }
 0x1a8   :  { %3062 = vmatprep.subr.bf16.mxu1 %v3397_v51 }
 0x1ab   :  { %3063 = vmatpush3.bf16.msra.mxu1 %v3397_v51 }
 0x1ac   :  { %3025 = vmatmul.mubr.f32.vlgmr.msra.gmra.mrb[0].mxu0 %v3698_v57  ;;  %v3495_v57 = vld [vmem:[%s5201_s0 + $0x10] sm:$0xff] }
 0x1ad   :  { %3027 = vmatprep.mubr.f32.mxu0 %v3702_v60 }
 0x1ae   :  { %v4253_v47 = vpop.permute.xlu1 %1929 }
 0x1b0   :  { %3028 = vmatmul.mubr.f32.gmra.mrb[2].mxu0 %v3696_v55  ;;  %v3496_v55 = vld [vmem:[%s5201_s0 + $0x18] sm:$0xff] }
 0x1b1   :  { %3030 = vmatprep.mubr.f32.mxu0 %v3733_v18  ;;  %v2101_v60 = vpack.c.bf16 %v3496_v55, %v3495_v57  ;;  %v3498_v18 = vld [vmem:[%s5201_s0 + $0x20] sm:$0xff] }
 0x1b3   :  { %3065 = vmatmul.mubr.bf16.vlgmr.msra.gmra.mrb[16].mxu1 %v2101_v60 }
 0x1b4   :  { %3031 = vmatmul.mubr.f32.gmra.mrb[4].mxu0 %v3731_v15  ;;  %v3497_v15 = vld [vmem:[%s5201_s0 + $0x28] sm:$0xff] }
 0x1b5   :  { %3033 = vmatprep.mubr.f32.mxu0 %v3755_v38  ;;  %v2102_v38 = vpack.c.bf16 %v3497_v15, %v3498_v18  ;;  %v4275_v18 = vpop.permute.xlu1 %1932 }
 0x1b7   :  { %3068 = vmatprep.mubr.bf16.mxu1 %v2102_v38 }
 0x1b8   :  { %3034 = vmatmul.mubr.f32.gmra.mrb[6].mxu0 %v3753_v10  ;;  %v3499_v10 = vld [vmem:[%s5201_s0 + $0x38] sm:$0xff] }
 0x1b9   :  { %3036 = vmatprep.mubr.f32.mxu0 %v3775_v53  ;;  %v3500_v53 = vld [vmem:[%s5201_s0 + $0x30] sm:$0xff] }
 0x1ba   :  { %v2103_v3 = vpack.c.bf16 %v3499_v10, %v3500_v53 }
 0x1bc   :  { %3037 = vmatmul.mubr.f32.gmra.mrb[8].mxu0 %v3773_v52  ;;  %v3501_v52 = vld [vmem:[%s5201_s0 + $0x48] sm:$0xff]  ;;  %3069 = vmatmul.mubr.bf16.gmra.mrb[20].mxu1 %v2103_v3 }
 0x1bd   :  { %3039 = vmatprep.mubr.f32.mxu0 %v3795_v8  ;;  %v3502_v8 = vld [vmem:[%s5201_s0 + $0x40] sm:$0xff] }
 0x1c0   :  { %3040 = vmatmul.mubr.f32.gmra.mrb[10].mxu0 %v3793_v14  ;;  %v2104_v14 = vpack.c.bf16 %v3501_v52, %v3502_v8 }
 0x1c1   :  { %3042 = vmatprep.mubr.f32.mxu0 %v3815_v36  ;;  %v3503_v36 = vld [vmem:[%s5201_s0 + $0x58] sm:$0xff] }
 0x1c2   :  { %3072 = vmatprep.mubr.bf16.mxu1 %v2104_v14  ;;  %v2105_v46 = vpack.c.bf16 %v3503_v36, %v3504_v59 }
 0x1c4   :  { %3043 = vmatmul.mubr.f32.gmra.mrb[12].mxu0 %v3813_v35  ;;  %v3506_v35 = vld [vmem:[%s5201_s0 + $0x60] sm:$0xff]  ;;  %3073 = vmatmul.mubr.bf16.gmra.mrb[24].mxu1 %v2105_v46 }
 0x1c5   :  { %3045 = vmatprep.mubr.f32.mxu0 %v3838_v49  ;;  %v2106_v49 = vpack.c.bf16 %v3505_v62, %v3506_v35 }
 0x1c7   :  { %3076 = vmatprep.mubr.bf16.mxu1 %v2106_v49 }
 0x1c8   :  { %3046 = vmatmul.mubr.f32.gmra.mrb[14].mxu0 %v3836_v48  ;;  %v3507_v48 = vld [vmem:[%s5201_s0 + $0x78] sm:$0xff] }
 0x1c9   :  { %v2107_v20 = vpack.c.bf16 %v3507_v48, %v3508_v54 }
 0x1cc   :  { %3077 = vmatmul.mubr.bf16.gmra.mrb[28].mxu1 %v2107_v20 }
 0x1fd   :  { %v2802_v9 = vpop.f32.mrb[0].mxu1 }
 0x1fe   :  { %v544_v0 = vpop.f32.mrb[1].mxu1 }
 0x201   :  { %v2805_v27 = vpop.f32.mrb[2].mxu1 }
 0x202   :  { %v556_v34 = vpop.f32.mrb[3].mxu1 }
 0x205   :  { %v2808_v2 = vpop.f32.mrb[4].mxu1 }
 0x206   :  { %v568_v40 = vpop.f32.mrb[5].mxu1 }
 0x209   :  { %v2811_v13 = vpop.f32.mrb[6].mxu1 }
 0x20a   :  { %v580_v4 = vpop.f32.mrb[7].mxu1 }
 0x20d   :  { %v2814_v30 = vpop.f32.mrb[8].mxu1 }
 0x20e   :  { %v592_v12 = vpop.f32.mrb[9].mxu1 }
 0x211   :  { %v4221_v19 = vpop.f32.mrb[10].mxu1 }
 0x212   :  { %v4223_v16 = vpop.f32.mrb[11].mxu1 }
 0x215   :  { %v4225_v31 = vpop.f32.mrb[12].mxu1 }
 0x216   :  { %v4227_v26 = vpop.f32.mrb[13].mxu1 }
 0x219   :  { %v4229_v37 = vpop.f32.mrb[14].mxu1 }
 0x21a   :  { %v4231_v42 = vpop.f32.mrb[15].mxu1 }
 0x27f   :  { %v3026_v6 = vpop.f32.mrb[0].mxu0 }
 0x280   :  { %v4233_v44 = vadd.f32 %v3026_v6, %v2802_v9  ;;  %v1348_v24 = vpop.f32.mrb[1].mxu0 }
 0x281   :  { %v4235_v41 = vadd.f32 %v1348_v24, %v544_v0 }
 0x282   :  { %v5221_v45 = vclamps-f32 %v4233_v44, 1.0 }
 0x283   :  { %v3029_v63 = vpop.f32.mrb[2].mxu0  ;;  %v5220_v1 = vclamps-f32 %v4235_v41, 1.0 }
 0x284   :  { %v4237_v32 = vadd.f32 %v3029_v63, %v2805_v27  ;;  %v1360_v61 = vpop.f32.mrb[3].mxu0  ;;  %v4247_v7 = vand.u32 2147483647, %v5221_v45  ;;  %v4298_v27 = vpop.permute.xlu1 %1850 }
 0x285   :  { %v4242_v28 = vadd.f32 %v1360_v61, %v556_v34  ;;  %v4259_v11 = vand.u32 2147483647, %v5220_v1 }
 0x286   :  { %v5217_v17 = vclamps-f32 %v4237_v32, 1.0  ;;  %v1635_v21 = vmul.f32 -0.0187293, %v4247_v7  ;;  %v1491_v14 = vsub.f32 1.0, %v4247_v7 }
 0x287   :  { %v3032_v23 = vpop.f32.mrb[4].mxu0  ;;  %v5218_v33 = vclamps-f32 %v4242_v28, 1.0  ;;  %v1634_v57 = vmul.f32 -0.0187293, %v4259_v11  ;;  %v1490_v35 = vsub.f32 1.0, %v4259_v11 }
 0x288   :  { %v4251_v22 = vadd.f32 %v3032_v23, %v2808_v2  ;;  %v1372_v43 = vpop.f32.mrb[5].mxu0  ;;  %v4264_v5 = vand.u32 2147483647, %v5217_v17  ;;  %v1651_v10 = vadd.f32 0.074261, %v1635_v21 }
 0x289   :  { %v4255_v39 = vadd.f32 %v1372_v43, %v568_v40  ;;  %v4268_v25 = vand.u32 2147483647, %v5218_v33  ;;  %v1650_v36 = vadd.f32 0.074261, %v1634_v57  ;;  %v4302_v40 = vmax.f32 %v1491_v14, 0.0 }
 0x28a   :  { %v5214_v29 = vclamps-f32 %v4251_v22, 1.0  ;;  %v1637_v53 = vmul.f32 -0.0187293, %v4264_v5  ;;  %v1667_v54 = vmul.f32 %v1651_v10, %v4247_v7  ;;  %v1493_v20 = vsub.f32 1.0, %v4264_v5 }
 0x28b   :  { %v3035_v56 = vpop.f32.mrb[6].mxu0  ;;  %v5216_v55 = vclamps-f32 %v4255_v39, 1.0  ;;  %v1636_v3 = vmul.f32 -0.0187293, %v4268_v25  ;;  %v4307_v6 = vmax.f32 %v1490_v35, 0.0  ;;  %v1492_v24 = vsub.f32 1.0, %v4268_v25  ;;  %v4333_v35 = vpop.permute.xlu1 %1853 }
 0x28c   :  { %v1384_v50 = vpop.f32.mrb[7].mxu0  ;;  %v4273_v60 = vadd.f32 %v3035_v56, %v2811_v13  ;;  %v4283_v52 = vand.u32 2147483647, %v5214_v29  ;;  %v1653_v9 = vadd.f32 0.074261, %v1637_v53  ;;  %v1666_v13 = vmul.f32 %v1650_v36, %v4259_v11 }
 0x28d   :  { %v4277_v38 = vadd.f32 %v1384_v50, %v580_v4  ;;  %v4288_v59 = vand.u32 2147483647, %v5216_v55  ;;  %v1652_v0 = vadd.f32 0.074261, %v1636_v3  ;;  %v2462_v43 = vadd.f32 -0.2121144, %v1667_v54 }
 0x28e   :  { %v5211_v49 = vclamps-f32 %v4273_v60, 1.0  ;;  %v1639_v34 = vmul.f32 -0.0187293, %v4283_v52  ;;  %v4315_v56 = vmax.f32 %v1493_v20, 0.0  ;;  %v1669_v21 = vmul.f32 %v1653_v9, %v4264_v5 }
 0x28f   :  { %v3038_v51 = vpop.f32.mrb[8].mxu0  ;;  %v5212_v2 = vclamps-f32 %v4277_v38, 1.0  ;;  %v1638_v4 = vmul.f32 -0.0187293, %v4288_v59  ;;  %v1668_v50 = vmul.f32 %v1652_v0, %v4268_v25  ;;  %v2461_v3 = vadd.f32 -0.2121144, %v1666_v13 }
 0x290   :  { %v1396_v15 = vpop.f32.mrb[9].mxu0  ;;  %v4290_v46 = vadd.f32 %v3038_v51, %v2814_v30  ;;  %v4312_v63 = vand.u32 2147483647, %v5211_v49  ;;  %v1655_v51 = vadd.f32 0.074261, %v1639_v34  ;;  %v4335_v54 = vmax.f32 %v1492_v24, 0.0 }
 0x291   :  { %v4294_v48 = vadd.f32 %v1396_v15, %v592_v12  ;;  %v4321_v57 = vand.u32 2147483647, %v5212_v2  ;;  %v1654_v14 = vadd.f32 0.074261, %v1638_v4  ;;  %v2463_v13 = vadd.f32 -0.2121144, %v1668_v50 }
 0x292   :  { %v5209_v30 = vclamps-f32 %v4290_v46, 1.0  ;;  %v1641_v20 = vmul.f32 -0.0187293, %v4312_v63  ;;  %v1671_v4 = vmul.f32 %v1655_v51, %v4283_v52  ;;  %v1494_v24 = vsub.f32 1.0, %v4288_v59 }
 0x293   :  { %v3041_v8 = vpop.f32.mrb[10].mxu0  ;;  %v5210_v61 = vclamps-f32 %v4294_v48, 1.0  ;;  %v1670_v49 = vmul.f32 %v1654_v14, %v4288_v59  ;;  %v4377_v14 = vpop.permute.xlu1 %1935  ;;  %3430 = vrsqrt.f32 %v4302_v40  ;;  %vm1531_vm1 = vcmp.eq.f32.partialorder %v4302_v40, inf }
 0x294   :  { %v1408_v62 = vpop.f32.mrb[11].mxu0  ;;  %v4324_v15 = vadd.f32 %v3041_v8, %v4221_v19  ;;  %v4331_v36 = vand.u32 2147483647, %v5209_v30  ;;  %v2464_v8 = vadd.f32 -0.2121144, %v1669_v21  ;;  %v4355_v21 = vmul.f32 %v2461_v3, %v4259_v11 }
 0x295   :  { %v4327_v10 = vadd.f32 %v1408_v62, %v4223_v16  ;;  %v4340_v19 = vand.u32 2147483647, %v5210_v61  ;;  %v1495_v62 = vsub.f32 1.0, %v4283_v52  ;;  %v1640_v30 = vmul.f32 -0.0187293, %v4321_v57 }
 0x296   :  { %5235 = vst [vmem:[#allocation5_spill] sm:$0xff] %v4324_v15  ;;  %v5213_v16 = vclamps-f32 %v4324_v15, 1.0  ;;  %v4352_v61 = vmul.f32 %v2462_v43, %v4247_v7  ;;  %v1643_v2 = vmul.f32 -0.0187293, %v4331_v36  ;;  %v4368_v7 = vmul.f32 %v2464_v8, %v4264_v5 }
 0x297   :  { %v3044_v12 = vpop.f32.mrb[12].mxu0  ;;  %5236 = vst [vmem:[#allocation6_spill] sm:$0xff] %v4327_v10  ;;  %v5215_v9 = vclamps-f32 %v4327_v10, 1.0  ;;  %v4370_v43 = vmax.f32 %v1495_v62, 0.0  ;;  %v4382_v29 = vmax.f32 %v1494_v24, 0.0  ;;  %v1497_v5 = vsub.f32 1.0, %v4312_v63 }
 0x298   :  { %v1420_v23 = vpop.f32.mrb[13].mxu0  ;;  %v4346_v0 = vadd.f32 %v3044_v12, %v4225_v31  ;;  %v1657_v31 = vadd.f32 0.074261, %v1641_v20  ;;  %v1642_v12 = vmul.f32 -0.0187293, %v4340_v19  ;;  %v4380_v20 = vmul.f32 %v2463_v13, %v4268_v25 }
 0x299   :  { %v4362_v50 = vand.u32 2147483647, %v5213_v16  ;;  %v4365_v51 = vadd.f32 %v1420_v23, %v4227_v26  ;;  %v4374_v11 = vand.u32 2147483647, %v5215_v9  ;;  %v2466_v16 = vadd.f32 -0.2121144, %v1671_v4 }
 0x29a   :  { %5237 = vst [vmem:[#allocation7_spill] sm:$0xff] %v4346_v0  ;;  %v5219_v3 = vclamps-f32 %v4346_v0, 1.0  ;;  %v1656_v26 = vadd.f32 0.074261, %v1640_v30  ;;  %v2465_v23 = vadd.f32 -0.2121144, %v1670_v49  ;;  %v1673_v9 = vmul.f32 %v1657_v31, %v4312_v63 }
 0x29b   :  { %v3047_v53 = vpop.f32.mrb[14].mxu0  ;;  %5238 = vst [vmem:[#allocation8_spill] sm:$0xff] %v4362_v50  ;;  %5239 = vst [vmem:[#allocation9_spill] sm:$0xff] %v4365_v51  ;;  %v1496_v8 = vsub.f32 1.0, %v4321_v57  ;;  %v1659_v62 = vadd.f32 0.074261, %v1643_v2  ;;  %v4401_v2 = vmul.f32 %v2466_v16, %v4283_v52  ;;  %3432 = vrsqrt.f32 %v4307_v6 }
 0x29c   :  { %v1432_v34 = vpop.f32.mrb[15].mxu0  ;;  %5240 = vst [vmem:[#allocation10_spill] sm:$0xff] %v4374_v11  ;;  %v1658_v55 = vadd.f32 0.074261, %v1642_v12  ;;  %v1645_v17 = vmul.f32 -0.0187293, %v4362_v50  ;;  %v4389_v33 = vadd.f32 %v3047_v53, %v4229_v37  ;;  %v1672_v4 = vmul.f32 %v1656_v26, %v4321_v57  ;;  %v4416_v26 = vpop.permute.xlu0 %1844 }
 0x29d   :  { %v1644_v25 = vmul.f32 -0.0187293, %v4374_v11  ;;  %v4394_v13 = vand.u32 2147483647, %v5219_v3  ;;  %v5223_v49 = vclamps-f32 %v4365_v51, 1.0  ;;  %v4398_v30 = vadd.f32 %v1432_v34, %v4231_v42  ;;  %v4411_v3 = vpop.permute.xlu1 %1938 }
 0x29e   :  { %5241 = vst [vmem:[#allocation11_spill] sm:$0xff] %v4389_v33  ;;  %v1499_v24 = vsub.f32 1.0, %v4331_v36  ;;  %v4406_v53 = vmax.f32 %v1497_v5, 0.0  ;;  %v1675_v31 = vmul.f32 %v1659_v62, %v4331_v36  ;;  %v2468_v42 = vadd.f32 -0.2121144, %v1673_v9 }
 0x29f   :  { %5242 = vst [vmem:[#allocation12_spill] sm:$0xff] %v4394_v13  ;;  %5243 = vst [vmem:[#allocation13_spill] sm:$0xff] %v4398_v30  ;;  %v4413_v34 = vmax.f32 %v1496_v8, 0.0  ;;  %v1674_v52 = vmul.f32 %v1658_v55, %v4340_v19  ;;  %v1661_v16 = vadd.f32 0.074261, %v1645_v17  ;;  %v4419_v1 = vmul.f32 %v2465_v23, %v4288_v59 }
 0x2a0   :  { %v1660_v5 = vadd.f32 0.074261, %v1644_v25  ;;  %v1647_v62 = vmul.f32 -0.0187293, %v4394_v13  ;;  %v4424_v45 = vand.u32 2147483647, %v5223_v49  ;;  %v4440_v49 = vmul.f32 %v2468_v42, %v4312_v63  ;;  %v4456_v42 = vpop.permute.xlu0 %1859 }
 0x2a1   :  { %v2467_v12 = vadd.f32 -0.2121144, %v1672_v4  ;;  %v4426_v37 = vmax.f32 %v1499_v24, 0.0  ;;  %v1498_v9 = vsub.f32 1.0, %v4340_v19  ;;  %v5244_v55 = vclamps-f32 %v4389_v33, 1.0  ;;  %v4447_v10 = vpop.permute.xlu1 %1856 }
 0x2a2   :  { %v2470_v8 = vadd.f32 -0.2121144, %v1675_v31  ;;  %v1501_v59 = vsub.f32 1.0, %v4362_v50  ;;  %v1500_v23 = vsub.f32 1.0, %v4374_v11  ;;  %v5245_v25 = vclamps-f32 %v4398_v30, 1.0 }
 0x2a3   :  { %v4431_v17 = vand.u32 2147483647, %v5244_v55  ;;  %v2469_v4 = vadd.f32 -0.2121144, %v1674_v52  ;;  %v1677_v24 = vmul.f32 %v1661_v16, %v4362_v50  ;;  %v1503_v51 = vsub.f32 1.0, %v4394_v13 }
 0x2a4   :  { %v4437_v0 = vand.u32 2147483647, %v5245_v25  ;;  %v1676_v55 = vmul.f32 %v1660_v5, %v4374_v11  ;;  %v1663_v33 = vadd.f32 0.074261, %v1647_v62  ;;  %v1502_v31 = vsub.f32 1.0, %v4424_v45  ;;  %v3431_v11 = vpop.eup %3430 }
 0x2a5   :  { %v1646_v15 = vmul.f32 -0.0187293, %v4424_v45  ;;  %v4450_v25 = vmul.f32 %v2467_v12, %v4321_v57  ;;  %v4452_v30 = vmax.f32 %v1498_v9, 0.0  ;;  %v1649_v63 = vmul.f32 -0.0187293, %v4431_v17 }
 0x2a6   :  { %v4459_v52 = vmul.f32 %v2470_v8, %v4331_v36  ;;  %v4461_v16 = vmax.f32 %v1501_v59, 0.0  ;;  %v4463_v5 = vmax.f32 %v1500_v23, 0.0  ;;  %v1648_v62 = vmul.f32 -0.0187293, %v4437_v0 }
 0x2a7   :  { %v4467_v57 = vmul.f32 %v2469_v4, %v4340_v19  ;;  %v4469_v12 = vadd.f32 -0.2121144, %v1677_v24  ;;  %v4471_v9 = vmax.f32 %v1503_v51, 0.0  ;;  %3434 = vrsqrt.f32 %v4335_v54  ;;  %v4492_v51 = vld [vmem:[%s5202_s1] ss:$0 sm:$0xff] }
 0x2a8   :  { %5246 = vst [vmem:[#allocation14_spill] sm:$0xff] %v4461_v16  ;;  %v5249_v50 = vclamps-f32 %v4233_v44, 1.0  ;;  %v4480_v8 = vadd.f32 -0.2121144, %v1676_v55  ;;  %v4483_v59 = vmul.f32 %v1663_v33, %v4394_v13  ;;  %v4485_v19 = vmax.f32 %v1502_v31, 0.0  ;;  %v4509_v55 = vpop.permute.xlu1 %1941 }
 0x2a9   :  { %5247 = vst [vmem:[#allocation15_spill] sm:$0xff] %v4469_v12  ;;  %5248 = vst [vmem:[#allocation16_spill] sm:$0xff] %v4471_v9  ;;  %v4487_v23 = vadd.f32 0.074261, %v1646_v15  ;;  %v4494_v4 = vadd.f32 0.074261, %v1649_v63  ;;  %3436 = vrsqrt.f32 %v4315_v56  ;;  %v4515_v63 = vpop.permute.xlu0 %1944  ;;  %vm1896_vm5 = vcmp.eq.s32.totalorder %v4239_v58, %v4492_v51 }
 0x2aa   :  { %vm4476_vm0 = vcmp.lt.f32.partialorder %v5249_v50, 0.0  ;;  %5252 = vst [vmem:[#allocation17_spill] sm:$0xff] %v4480_v8  ;;  %5253 = vst [vmem:[#allocation18_spill] sm:$0xff] %v4483_v59  ;;  %v1530_v50 = vmul.f32 %v3431_v11, %v4302_v40  ;;  %v4499_v24 = vadd.f32 0.074261, %v1648_v62  ;;  %vm1533_vm2 = vcmp.eq.f32.partialorder %v4302_v40, 0.0 }
 0x2ab   :  { %5254 = vst [vmem:[#allocation19_spill] sm:$0xff] %v4485_v19  ;;  %v1534_v33 = vand.u32 2147483648, %v4302_v40  ;;  %v4507_v15 = vld [vmem:[%s5204_s3] ss:$0 sm:$0xff]  ;;  %v1715_v11 = vadd.f32 1.5707288, %v4352_v61  ;;  %3438 = vrsqrt.f32 %v4382_v29 }
 0x2ac   :  { %v1532_v31 = vsel %vm1531_vm1, %v4302_v40, %v1530_v50  ;;  %vm1524_vm3 = vcmp.eq.f32.partialorder %v4307_v6, inf  ;;  %vm1526_vm4 = vcmp.eq.f32.partialorder %v4307_v6, 0.0  ;;  %v1527_v44 = vand.u32 2147483648, %v4307_v6 }
 0x2ad   :  { %v1535_v62 = vsel %vm1533_vm2, %v1534_v33, %v1532_v31  ;;  %v1714_v13 = vadd.f32 1.5707288, %v4355_v21  ;;  %vm1538_vm6 = vcmp.eq.f32.partialorder %v4335_v54, inf  ;;  %vm1540_vm7 = vcmp.eq.f32.partialorder %v4335_v54, 0.0  ;;  %v3433_v21 = vpop.eup %3432  ;;  %v4564_v16 = vpop.permute.xlu0 %1865 }
 0x2ae   :  { %v1731_v9 = vmul.f32 %v1715_v11, %v1535_v62  ;;  %3440 = vrsqrt.f32 %v4370_v43  ;;  %vm1981_vm8 = vcmp.eq.s32.totalorder %v4275_v18, %v4507_v15  ;;  %v1541_v40 = vand.u32 2147483648, %v4335_v54 }
 0x2af   :  { %v1716_v61 = vadd.f32 1.5707288, %v4380_v20  ;;  %vm1545_vm9 = vcmp.eq.f32.partialorder %v4315_v56, inf  ;;  %3442 = vrsqrt.f32 %v4413_v34  ;;  %v5255_v50 = vclamps-f32 %v4235_v41, 1.0 }
 0x2b0   :  { %v1763_v31 = vsub.f32 3.1415927, %v1731_v9  ;;  %vm1547_vm11 = vcmp.eq.f32.partialorder %v4315_v56, 0.0  ;;  %v1548_v11 = vand.u32 2147483648, %v4315_v56  ;;  %v1717_v62 = vadd.f32 1.5707288, %v4368_v7 }
 0x2b1   :  { %vm4533_vm10 = vcmp.lt.f32.partialorder %v5255_v50, 0.0  ;;  %v1523_v20 = vmul.f32 %v3433_v21, %v4307_v6  ;;  %vm1552_vm12 = vcmp.eq.f32.partialorder %v4382_v29, inf  ;;  %v4544_v12 = vadd.f32 1.5707288, %v4419_v1  ;;  %v3435_v41 = vpop.eup %3434  ;;  %v4547_v50 = vpop.permute.xlu1 %1862 }
 0x2b2   :  { %3444 = vrsqrt.f32 %v4406_v53  ;;  %v5258_v19 = vclamps-f32 %v4242_v28, 1.0  ;;  %v1779_v7 = vsel %vm4476_vm0, %v1763_v31, %v1731_v9  ;;  %vm1554_vm14 = vcmp.eq.f32.partialorder %v4382_v29, 0.0 }
 0x2b3   :  { %vm1559_vm15 = vcmp.eq.f32.partialorder %v4370_v43, inf  ;;  %v4561_v21 = vadd.f32 1.5707288, %v4401_v2  ;;  %v1569_v8 = vand.u32 2147483648, %v4413_v34  ;;  %v1795_v28 = vmul.f32 0.31830987, %v1779_v7  ;;  %v3437_v31 = vpop.eup %3436 }
 0x2b4   :  { %vm4551_vm13 = vcmp.lt.f32.partialorder %v5258_v19, 0.0  ;;  %v1525_v19 = vsel %vm1524_vm3, %v4307_v6, %v1523_v20  ;;  %v1537_v9 = vmul.f32 %v3435_v41, %v4335_v54  ;;  %v4572_v36 = vadd.f32 1.5707288, %v4450_v25 }
 0x2b5   :  { %v5261_v2 = vclamps-f32 %v4237_v32, 1.0  ;;  %v1528_v7 = vsel %vm1526_vm4, %v1527_v44, %v1525_v19  ;;  %v1576_v20 = vand.u32 2147483648, %v4406_v53  ;;  %v4585_v41 = vadd.f32 1.5707288, %v4440_v49  ;;  %v3439_v44 = vpop.eup %3438 }
 0x2b6   :  { %3446 = vrsqrt.f32 %v4452_v30  ;;  %vm1895_vm3 = vcmp.eq.s32.totalorder %v4416_v26, %v4492_v51  ;;  %v1811_v32 = vsub.f32 1.0, %v1795_v28  ;;  %v1730_v25 = vmul.f32 %v1714_v13, %v1528_v7 }
 0x2b7   :  { %vm4576_vm1 = vcmp.lt.f32.partialorder %v5261_v2, 0.0  ;;  %v1539_v2 = vsel %vm1538_vm6, %v4335_v54, %v1537_v9  ;;  %v1544_v6 = vmul.f32 %v3437_v31, %v4315_v56  ;;  %vm1568_vm2 = vcmp.eq.f32.partialorder %v4413_v34, 0.0 }
 0x2b8   :  { %v1542_v49 = vsel %vm1540_vm7, %v1541_v40, %v1539_v2  ;;  %vm1573_vm0 = vcmp.eq.f32.partialorder %v4406_v53, inf  ;;  %v1583_v28 = vand.u32 2147483648, %v4452_v30  ;;  %v4602_v13 = vadd.f32 1.5707288, %v4467_v57  ;;  %v3441_v7 = vpop.eup %3440  ;;  %v4621_v2 = vpop.permute.xlu1 %1947 }
 0x2b9   :  { %3448 = vrsqrt.f32 %v4426_v37  ;;  %v5264_v19 = vclamps-f32 %v4255_v39, 1.0  ;;  %v1997_v54 = vsel %vm1896_vm5, %v1811_v32, 0.0  ;;  %v1762_v40 = vsub.f32 3.1415927, %v1730_v25 }
 0x2ba   :  { %v1732_v31 = vmul.f32 %v1716_v61, %v1542_v49  ;;  %v1546_v57 = vsel %vm1545_vm9, %v4315_v56, %v1544_v6  ;;  %vm1982_vm7 = vcmp.eq.s32.totalorder %v4377_v14, %v4507_v15  ;;  %v5267_v39 = vclamps-f32 %v4251_v22, 1.0  ;;  %v3443_v49 = vpop.eup %3442  ;;  %v4640_v22 = vpop.permute.xlu0 %1950 }
 0x2bb   :  { %vm4609_vm4 = vcmp.lt.f32.partialorder %v5264_v19, 0.0  ;;  %v4632_v58 = vsel %vm1981_vm8, 1.0, %v1997_v54  ;;  %v1549_v61 = vsel %vm1547_vm11, %v1548_v11, %v1546_v57  ;;  %v1551_v32 = vmul.f32 %v3439_v44, %v4382_v29 }
 0x2bc   :  { %vm4625_vm6 = vcmp.lt.f32.partialorder %v5267_v39, 0.0  ;;  %vm1898_vm5 = vcmp.eq.s32.totalorder %v4333_v35, %v4492_v51  ;;  %2030 = vadd.xlane.f32.xlu0 %v4632_v58  ;;  %v1778_v18 = vsel %vm4533_vm10, %v1762_v40, %v1730_v25  ;;  %v1764_v54 = vsub.f32 3.1415927, %v1732_v31  ;;  %v3445_v33 = vpop.eup %3444 }
 0x2bd   :  { %v1733_v39 = vmul.f32 %v1717_v62, %v1549_v61  ;;  %v1558_v56 = vmul.f32 %v3441_v7, %v4370_v43  ;;  %vm1575_vm8 = vcmp.eq.f32.partialorder %v4406_v53, 0.0  ;;  %vm1983_vm9 = vcmp.eq.s32.totalorder %v4411_v3, %v4507_v15 }
 0x2be   :  { %v1794_v11 = vmul.f32 0.31830987, %v1778_v18  ;;  %v1553_v44 = vsel %vm1552_vm12, %v4382_v29, %v1551_v32  ;;  %v1565_v57 = vmul.f32 %v3443_v49, %v4413_v34  ;;  %v4654_v6 = vadd.f32 1.5707288, %v4459_v52 }
 0x2bf   :  { %v1780_v62 = vsel %vm4551_vm13, %v1764_v54, %v1732_v31  ;;  %v1765_v25 = vsub.f32 3.1415927, %v1733_v39  ;;  %v5270_v40 = vand.u32 2147483648, %v4382_v29  ;;  %v1560_v61 = vsel %vm1559_vm15, %v4370_v43, %v1558_v56 }
 0x2c0   :  { %v5271_v52 = vclamps-f32 %v4277_v38, 1.0  ;;  %v1810_v31 = vsub.f32 1.0, %v1794_v11  ;;  %v1796_v32 = vmul.f32 0.31830987, %v1780_v62  ;;  %v5274_v49 = vand.u32 2147483648, %v4370_v43  ;;  %v3447_v56 = vpop.eup %3446  ;;  %v4691_v11 = vpop.permute.xlu1 %1868 }
 0x2c1   :  { %v1556_v7 = vsel %vm1554_vm14, %v5270_v40, %v1553_v44  ;;  %vm5275_vm13 = vcmp.eq.f32.partialorder %v4370_v43, 0.0  ;;  %vm1582_vm14 = vcmp.eq.f32.partialorder %v4452_v30, 0.0  ;;  %vm1984_vm15 = vcmp.eq.s32.totalorder %v4509_v55, %v4507_v15 }
 0x2c2   :  { %vm4670_vm12 = vcmp.lt.f32.partialorder %v5271_v52, 0.0  ;;  %v1734_v29 = vmul.f32 %v4544_v12, %v1556_v7  ;;  %v1563_v18 = vsel %vm5275_vm13, %v5274_v49, %v1560_v61  ;;  %v1781_v38 = vsel %vm4576_vm1, %v1765_v25, %v1733_v39 }
 0x2c3   :  { %v1735_v54 = vmul.f32 %v4561_v21, %v1563_v18  ;;  %vm5276_vm10 = vcmp.eq.f32.partialorder %v4413_v34, inf  ;;  %v1572_v43 = vmul.f32 %v3445_v33, %v4406_v53  ;;  %vm1985_vm13 = vcmp.eq.s32.totalorder %v4515_v63, %v4507_v15  ;;  %v4705_v33 = vpop.permute.xlu0 %1871  ;;  %v3449_v7 = vpop.eup %3448 }
 0x2c4   :  { %v1567_v12 = vsel %vm5276_vm10, %v4413_v34, %v1565_v57  ;;  %v5277_v44 = vclamps-f32 %v4273_v60, 1.0  ;;  %v1996_v1 = vsel %vm1895_vm3, %v1810_v31, 0.0  ;;  %v1812_v21 = vsub.f32 1.0, %v1796_v32 }
 0x2c5   :  { %v1797_v39 = vmul.f32 0.31830987, %v1781_v38  ;;  %v1766_v57 = vsub.f32 3.1415927, %v1734_v29  ;;  %vm1587_vm1 = vcmp.eq.f32.partialorder %v4426_v37, inf  ;;  %vm5280_vm10 = vcmp.eq.s32.totalorder %v4253_v47, %v4507_v15  ;;  %v4759_v38 = vpop.permute.xlu1 %1953 }
 0x2c6   :  { %vm4697_vm11 = vcmp.lt.f32.partialorder %v5277_v44, 0.0  ;;  %v2012_v25 = vsel %vm5280_vm10, 1.0, %v1996_v1  ;;  %v1767_v60 = vsub.f32 3.1415927, %v1735_v54  ;;  %v1570_v40 = vsel %vm1568_vm2, %v1569_v8, %v1567_v12 }
 0x2c7   :  { %v1574_v26 = vsel %vm1573_vm0, %v4406_v53, %v1572_v43  ;;  %2028 = vadd.xlane.f32.xlu1 %v2012_v25  ;;  %v2076_v61 = vpack.c.bf16 %v4632_v58, %v2012_v25  ;;  %vm5281_vm3 = vcmp.eq.s32.totalorder %v4298_v27, %v4492_v51  ;;  %v1813_v47 = vsub.f32 1.0, %v1797_v39  ;;  %v4770_v12 = vpop.permute.xlu0 %1956  ;;  %v5299_v43 = vld [vmem:[#allocation17_spill] sm:$0xff] }
 0x2c8   :  { %v1998_v52 = vsel %vm5281_vm3, %v1812_v21, 0.0  ;;  %v1782_v31 = vsel %vm4609_vm4, %v1766_v57, %v1734_v29  ;;  %vm1589_vm10 = vcmp.eq.f32.partialorder %v4426_v37, 0.0  ;;  %vm1901_vm2 = vcmp.eq.s32.totalorder %v4547_v50, %v4492_v51  ;;  %v5293_v50 = vld [vmem:[#allocation18_spill] sm:$0xff] }
 0x2c9   :  { %v5282_v34 = vclamps-f32 %v4294_v48, 1.0  ;;  %v4735_v27 = vsel %vm1982_vm7, 1.0, %v1998_v52  ;;  %v1798_v58 = vmul.f32 0.31830987, %v1782_v31  ;;  %v1783_v9 = vsel %vm4625_vm6, %v1767_v60, %v1735_v54  ;;  %3096 = vmatprep.mubr.bf16.mxu1 %v2076_v61 }
 0x2ca   :  { %v1736_v32 = vmul.f32 %v4572_v36, %v1570_v40  ;;  %vm1986_vm4 = vcmp.eq.s32.totalorder %v4621_v2, %v4507_v15  ;;  %2032 = vadd.xlane.f32.xlu0 %v4735_v27  ;;  %v1999_v48 = vsel %vm1898_vm5, %v1813_v47, 0.0  ;;  %v1799_v29 = vmul.f32 0.31830987, %v1783_v9 }
 0x2cb   :  { %vm4728_vm0 = vcmp.lt.f32.partialorder %v5282_v34, 0.0  ;;  %v1577_v14 = vsel %vm1575_vm8, %v1576_v20, %v1574_v26  ;;  %v1579_v19 = vmul.f32 %v3447_v56, %v4452_v30  ;;  %vm1902_vm6 = vcmp.eq.s32.totalorder %v4564_v16, %v4492_v51  ;;  %v4835_v52 = vpop.permute.xlu0 %1877  ;;  %v5292_v34 = vld [vmem:[#allocation14_spill] sm:$0xff]  ;;  %v5295_v16 = vld [vmem:[#allocation19_spill] sm:$0xff] }
 0x2cc   :  { %v4756_v36 = vsel %vm1983_vm9, 1.0, %v1999_v48  ;;  %v1814_v49 = vsub.f32 1.0, %v1798_v58  ;;  %v1768_v18 = vsub.f32 3.1415927, %v1736_v32  ;;  %v1737_v35 = vmul.f32 %v4585_v41, %v1577_v14 }
 0x2cd   :  { %vm1987_vm7 = vcmp.eq.s32.totalorder %v4640_v22, %v4507_v15  ;;  %v2077_v53 = vpack.c.bf16 %v4756_v36, %v4735_v27  ;;  %2034 = vadd.xlane.f32.xlu1 %v4756_v36  ;;  %v1815_v20 = vsub.f32 1.0, %v1799_v29  ;;  %vm5285_vm5 = vcmp.eq.f32.partialorder %v4452_v30, inf  ;;  %v5155_v36 = vld [vmem:[%s5207_s6] ss:$0 sm:$0xff]  ;;  %s3534_s6 = smov [#allocation2]  }
 0x2ce   :  { %v1581_v3 = vsel %vm5285_vm5, %v4452_v30, %v1579_v19  ;;  %v1586_v54 = vmul.f32 %v3449_v7, %v4426_v37  ;;  %v5286_v41 = vclamps-f32 %v4290_v46, 1.0  ;;  %vm5289_vm9 = vcmp.eq.s32.totalorder %v4447_v10, %v4492_v51  ;;  %v4825_v7 = vpop.permute.xlu1 %1874  ;;  %s2434_s25 = sshll.u32 %s3534_s6, 4  ;;  %s2435_s25 = int_to_ptr.vmem [resolvable:$true] %s2434_s25 }
 0x2cf   :  { %v2000_v56 = vsel %vm5289_vm9, %v1814_v49, 0.0  ;;  %v1784_v44 = vsel %vm4670_vm12, %v1768_v18, %v1736_v32  ;;  %v1769_v1 = vsub.f32 3.1415927, %v1737_v35  ;;  %v1584_v21 = vsel %vm1582_vm14, %v1583_v28, %v1581_v3  ;;  %s3509_s26 = scalar_lea.vmem %s2435_s25, 2048  ;;  %p3514_p1 = scmp.lt.s32.totalorder %s2435_s25, %s2435_s25 }
 0x2d0   :  { %vm4774_vm8 = vcmp.lt.f32.partialorder %v5286_v41, 0.0  ;;  %vm1903_vm3 = vcmp.eq.s32.totalorder %v4691_v11, %v4492_v51  ;;  %v4792_v46 = vsel %vm1984_vm15, 1.0, %v2000_v56  ;;  %vm5290_vm5 = vcmp.eq.s32.totalorder %v4456_v42, %v4492_v51  ;;  %v5297_v41 = vld [vmem:[#allocation15_spill] sm:$0xff]  ;;  %v5301_v11 = vld [vmem:[#allocation6_spill] sm:$0xff]  ;;  %p3510_p0 = scmp.ne.s32.totalorder %s2435_s25, %s3509_s26  ;;  %p3515_p2 = scmp.lt.s32.totalorder %s3509_s26, %s3509_s26 }
 0x2d1   :  { %v2001_v10 = vsel %vm5290_vm5, %v1815_v20, 0.0  ;;  %v1800_v59 = vmul.f32 0.31830987, %v1784_v44  ;;  %v1738_v39 = vmul.f32 %v4602_v13, %v1584_v21  ;;  %vm1988_vm12 = vcmp.eq.s32.totalorder %v4759_v38, %v4507_v15  ;;  %2036 = vadd.xlane.f32.xlu0 %v4792_v46  ;;  %v5298_v44 = vld [vmem:[#allocation10_spill] sm:$0xff] }
 0x2d2   :  { %v4804_v30 = vsel %vm1985_vm13, 1.0, %v2001_v10  ;;  %v1785_v55 = vsel %vm4697_vm11, %v1769_v1, %v1737_v35  ;;  %v1588_v42 = vsel %vm1587_vm1, %v4426_v37, %v1586_v54  ;;  %3450 = vrsqrt.f32 %v4463_v5  ;;  %v4871_v3 = vpop.permute.xlu1 %1959  ;;  %v5296_v54 = vld [vmem:[#allocation8_spill] sm:$0xff]  ;;  %p3516_p3 = por %p3515_p2, %p3514_p1 }
 0x2d3   :  { %2038 = vadd.xlane.f32.xlu1 %v4804_v30  ;;  %v2078_v28 = vpack.c.bf16 %v4804_v30, %v4792_v46  ;;  %v1816_v13 = vsub.f32 1.0, %v1800_v59  ;;  %v1801_v57 = vmul.f32 0.31830987, %v1785_v55  ;;  %v1770_v25 = vsub.f32 3.1415927, %v1738_v39  ;;  %v5300_v10 = vld [vmem:[#allocation16_spill] sm:$0xff] }
 0x2d4   :  { %v1678_v63 = vmul.f32 %v4487_v23, %v4424_v45  ;;  %v1681_v62 = vmul.f32 %v4494_v4, %v4431_v17  ;;  %v1680_v60 = vmul.f32 %v4499_v24, %v4437_v0  ;;  %v5291_v40 = vand.u32 2147483648, %v4426_v37  ;;  %p3517_p4 = pnand %p3516_p3, %p3510_p0 }
 0x2d5   :  { %vm1904_vm11 = vcmp.eq.s32.totalorder %v4705_v33, %v4492_v51  ;;  %v2002_v23 = vsel %vm1901_vm2, %v1816_v13, 0.0  ;;  %v1817_v61 = vsub.f32 1.0, %v1801_v57  ;;  %v1786_v4 = vsel %vm4728_vm0, %v1770_v25, %v1738_v39  ;;  %v4883_v39 = vpop.permute.xlu0 %1962  ;;  %v5305_v13 = vld [vmem:[#allocation12_spill] sm:$0xff] }
 0x2d6   :  { %v1591_v26 = vsel %vm1589_vm10, %v5291_v40, %v1588_v42  ;;  %v1505_v37 = vsub.f32 1.0, %v4431_v17  ;;  %v4841_v47 = vsel %vm1986_vm4, 1.0, %v2002_v23  ;;  %v1802_v31 = vmul.f32 0.31830987, %v1786_v4  ;;  %v4901_v40 = vpop.f32.mrb[16].mxu1  ;;  %v5306_v4 = vld [vmem:[#allocation5_spill] sm:$0xff] }
 0x2d7   :  { %v1739_v24 = vmul.f32 %v4654_v6, %v1591_v26  ;;  %3452 = vrsqrt.f32 %v5292_v34  ;;  %v2474_v58 = vadd.f32 -0.2121144, %v5293_v50  ;;  %v5294_v9 = vsub.f32 1.0, %v4437_v0  ;;  %2040 = vadd.xlane.f32.xlu0 %v4841_v47 }
 0x2d8   :  { %v2003_v6 = vsel %vm1902_vm6, %v1817_v61, 0.0  ;;  %v2473_v48 = vadd.f32 -0.2121144, %v1678_v63  ;;  %v2476_v2 = vadd.f32 -0.2121144, %v1681_v62  ;;  %v1818_v14 = vsub.f32 1.0, %v1802_v31  ;;  %v4929_v31 = vpop.permute.xlu1 %1880 }
 0x2d9   :  { %v4847_v8 = vmax.f32 %v5294_v9, 0.0  ;;  %v1771_v32 = vsub.f32 3.1415927, %v1739_v24  ;;  %v4856_v29 = vsel %vm1987_vm7, 1.0, %v2003_v6  ;;  %v2475_v19 = vadd.f32 -0.2121144, %v1680_v60  ;;  %v4935_v6 = vpop.permute.xlu0 %1883 }
 0x2da   :  { %2042 = vadd.xlane.f32.xlu1 %v4856_v29  ;;  %v2079_v49 = vpack.c.bf16 %v4856_v29, %v4841_v47  ;;  %3454 = vrsqrt.f32 %v5295_v16  ;;  %vm1989_vm14 = vcmp.eq.s32.totalorder %v4770_v12, %v4507_v15  ;;  %v4866_v35 = vmax.f32 %v1505_v37, 0.0 }
 0x2db   :  { %v1787_v18 = vsel %vm4774_vm8, %v1771_v32, %v1739_v24  ;;  %v2004_v22 = vsel %vm1903_vm3, %v1818_v14, 0.0  ;;  %v1709_v56 = vmul.f32 %v5297_v41, %v5296_v54  ;;  %v1708_v1 = vmul.f32 %v5299_v43, %v5298_v44  ;;  %v5310_v14 = vld [vmem:[#allocation9_spill] sm:$0xff] }
 0x2dc   :  { %v1803_v20 = vmul.f32 0.31830987, %v1787_v18  ;;  %v4880_v21 = vsel %vm1988_vm12, 1.0, %v2004_v22  ;;  %3456 = vrsqrt.f32 %v5300_v10  ;;  %v3451_v59 = vpop.eup %3450  ;;  %v5302_v55 = vclamps-f32 %v5301_v11, 1.0 }
 0x2dd   :  { %v1711_v57 = vmul.f32 %v2474_v58, %v5305_v13  ;;  %v1710_v25 = vmul.f32 %v2473_v48, %v4424_v45  ;;  %v4894_v63 = vmul.f32 %v2476_v2, %v4431_v17  ;;  %2044 = vadd.xlane.f32.xlu0 %v4880_v21  ;;  %v1712_v62 = vmul.f32 %v2475_v19, %v4437_v0 }
 0x2de   :  { %vm4887_vm15 = vcmp.lt.f32.partialorder %v5302_v55, 0.0  ;;  %v1819_v38 = vsub.f32 1.0, %v1803_v20  ;;  %v1593_v60 = vmul.f32 %v3451_v59, %v4463_v5  ;;  %vm1594_vm13 = vcmp.eq.f32.partialorder %v4463_v5, inf }
 0x2df   :  { %3458 = vrsqrt.f32 %v4847_v8  ;;  %vm1596_vm1 = vcmp.eq.f32.partialorder %v4463_v5, 0.0  ;;  %v1597_v17 = vand.u32 2147483648, %v4463_v5  ;;  %v1724_v23 = vadd.f32 1.5707288, %v1708_v1 }
 0x2e0   :  { %v2005_v45 = vsel %vm1904_vm11, %v1819_v38, 0.0  ;;  %3460 = vrsqrt.f32 %v4866_v35  ;;  %v1595_v26 = vsel %vm1594_vm13, %v4463_v5, %v1593_v60  ;;  %vm1601_vm10 = vcmp.eq.f32.partialorder %v5292_v34, inf  ;;  %v1966_v60 = vpop.permute.xlu1 %1965 }
 0x2e1   :  { %v4912_v0 = vsel %vm1989_vm14, 1.0, %v2005_v45  ;;  %v3453_v61 = vpop.eup %3452  ;;  %v5307_v33 = vclamps-f32 %v5306_v4, 1.0  ;;  %v1598_v12 = vsel %vm1596_vm1, %v1597_v17, %v1595_v26  ;;  %vm1603_vm0 = vcmp.eq.f32.partialorder %v5292_v34, 0.0 }
 0x2e2   :  { %2046 = vadd.xlane.f32.xlu1 %v4912_v0  ;;  %v2080_v37 = vpack.c.bf16 %v4912_v0, %v4880_v21  ;;  %v1604_v5 = vand.u32 2147483648, %v5292_v34  ;;  %vm1905_vm4 = vcmp.eq.s32.totalorder %v4825_v7, %v4492_v51  ;;  %v1740_v50 = vmul.f32 %v1724_v23, %v1598_v12  ;;  %v1969_v23 = vpop.permute.xlu0 %1968 }
 0x2e3   :  { %vm4918_vm2 = vcmp.lt.f32.partialorder %v5307_v33, 0.0  ;;  %v1600_v58 = vmul.f32 %v3453_v61, %v5292_v34  ;;  %v1725_v9 = vadd.f32 1.5707288, %v1709_v56  ;;  %vm1608_vm6 = vcmp.eq.f32.partialorder %v5295_v16, inf }
 0x2e4   :  { %vm1990_vm7 = vcmp.eq.s32.totalorder %v4871_v3, %v4507_v15  ;;  %vm1610_vm8 = vcmp.eq.f32.partialorder %v5295_v16, 0.0  ;;  %v1611_v32 = vand.u32 2147483648, %v5295_v16  ;;  %v1726_v48 = vadd.f32 1.5707288, %v1710_v25  ;;  %v3455_v2 = vpop.eup %3454  ;;  %v4965_v25 = vpop.f32.mrb[17].mxu1 }
 0x2e5   :  { %vm1615_vm9 = vcmp.eq.f32.partialorder %v5300_v10, inf  ;;  %v5311_v19 = vclamps-f32 %v5310_v14, 1.0  ;;  %v1772_v22 = vsub.f32 3.1415927, %v1740_v50  ;;  %v1602_v20 = vsel %vm1601_vm10, %v5292_v34, %v1600_v58  ;;  %v4971_v17 = vpop.f32.mrb[18].mxu1 }
 0x2e6   :  { %vm1617_vm5 = vcmp.eq.f32.partialorder %v5300_v10, 0.0  ;;  %v1618_v54 = vand.u32 2147483648, %v5300_v10  ;;  %v1605_v41 = vsel %vm1603_vm0, %v1604_v5, %v1602_v20  ;;  %v1607_v56 = vmul.f32 %v3455_v2, %v5295_v16  ;;  %v3457_v43 = vpop.eup %3456  ;;  %v4988_v2 = vpop.f32.mrb[19].mxu1 }
 0x2e7   :  { %vm4942_vm3 = vcmp.lt.f32.partialorder %v5311_v19, 0.0  ;;  %v1727_v44 = vadd.f32 1.5707288, %v1711_v57  ;;  %vm1622_vm12 = vcmp.eq.f32.partialorder %v4847_v8, inf  ;;  %vm1906_vm11 = vcmp.eq.s32.totalorder %v4835_v52, %v4492_v51  ;;  %v5002_v19 = vpop.f32.mrb[20].mxu1 }
 0x2e8   :  { %v1788_v1 = vsel %vm4887_vm15, %v1772_v22, %v1740_v50  ;;  %v1741_v59 = vmul.f32 %v1725_v9, %v1605_v41  ;;  %vm1624_vm14 = vcmp.eq.f32.partialorder %v4847_v8, 0.0  ;;  %v1625_v11 = vand.u32 2147483648, %v4847_v8  ;;  %v1887_v41 = vpop.permute.xlu1 %1886  ;;  %v5026_v52 = vpop.f32.mrb[21].mxu1 }
 0x2e9   :  { %v1804_v55 = vmul.f32 0.31830987, %v1788_v1  ;;  %v1609_v34 = vsel %vm1608_vm6, %v5295_v16, %v1607_v56  ;;  %v1614_v13 = vmul.f32 %v3457_v43, %v5300_v10  ;;  %v1728_v57 = vadd.f32 1.5707288, %v1712_v62  ;;  %v3459_v38 = vpop.eup %3458  ;;  %v5314_v56 = vld [vmem:[#allocation7_spill] sm:$0xff] }
 0x2ea   :  { %v1773_v45 = vsub.f32 3.1415927, %v1741_v59  ;;  %v1612_v42 = vsel %vm1610_vm8, %v1611_v32, %v1609_v34  ;;  %vm1629_vm15 = vcmp.eq.f32.partialorder %v4866_v35, inf  ;;  %vm1631_vm13 = vcmp.eq.f32.partialorder %v4866_v35, 0.0  ;;  %v3461_v26 = vpop.eup %3460 }
 0x2eb   :  { %vm1907_vm1 = vcmp.eq.s32.totalorder %v4929_v31, %v4492_v51  ;;  %v1820_v62 = vsub.f32 1.0, %v1804_v55  ;;  %v1742_v61 = vmul.f32 %v1726_v48, %v1612_v42  ;;  %v1616_v4 = vsel %vm1615_vm9, %v5300_v10, %v1614_v13  ;;  %v5318_v42 = vld [vmem:[#allocation11_spill] sm:$0xff] }
 0x2ec   :  { %v1621_v16 = vmul.f32 %v3459_v38, %v4847_v8  ;;  %v1789_v33 = vsel %vm4918_vm2, %v1773_v45, %v1741_v59  ;;  %v1619_v12 = vsel %vm1617_vm5, %v1618_v54, %v1616_v4  ;;  %v1628_v5 = vmul.f32 %v3461_v26, %v4866_v35  ;;  %v1890_v59 = vpop.permute.xlu0 %1889  ;;  %v5033_v4 = vpop.f32.mrb[22].mxu1 }
 0x2ed   :  { %v1632_v50 = vand.u32 2147483648, %v4866_v35  ;;  %v2006_v58 = vsel %vm1905_vm4, %v1820_v62, 0.0  ;;  %v1805_v9 = vmul.f32 0.31830987, %v1789_v33  ;;  %v1774_v32 = vsub.f32 3.1415927, %v1742_v61 }
 0x2ee   :  { %v1743_v48 = vmul.f32 %v1727_v44, %v1619_v12  ;;  %v4993_v24 = vsel %vm1990_vm7, 1.0, %v2006_v58  ;;  %v1623_v10 = vsel %vm1622_vm12, %v4847_v8, %v1621_v16  ;;  %v1630_v14 = vsel %vm1629_vm15, %v4866_v35, %v1628_v5  ;;  %v1972_v5 = vpop.permute.xlu1 %1971 }
 0x2ef   :  { %v1729_v7 = vadd.f32 1.5707288, %v4894_v63  ;;  %2048 = vadd.xlane.f32.xlu0 %v4993_v24  ;;  %v1821_v22 = vsub.f32 1.0, %v1805_v9  ;;  %v1790_v3 = vsel %vm4942_vm3, %v1774_v32, %v1742_v61  ;;  %v1626_v54 = vsel %vm1624_vm14, %v1625_v11, %v1623_v10 }
 0x2f0   :  { %v1775_v20 = vsub.f32 3.1415927, %v1743_v48  ;;  %v5315_v44 = vclamps-f32 %v5314_v56, 1.0  ;;  %v1806_v43 = vmul.f32 0.31830987, %v1790_v3  ;;  %v1744_v1 = vmul.f32 %v1728_v57, %v1626_v54  ;;  %v5316_v57 = vld [vmem:[#allocation13_spill] sm:$0xff]  ;;  %v1975_v31 = vpop.permute.xlu0 %1974 }
 0x2f1   :  { %v1633_v63 = vsel %vm1631_vm13, %v1632_v50, %v1630_v14  ;;  %vm1991_vm2 = vcmp.eq.s32.totalorder %v4883_v39, %v4507_v15  ;;  %v2007_v18 = vsel %vm1906_vm11, %v1821_v22, 0.0  ;;  %vm1992_vm0 = vcmp.eq.s32.totalorder %v1966_v60, %v4507_v15 }
 0x2f2   :  { %vm1759_vm10 = vcmp.lt.f32.partialorder %v5315_v44, 0.0  ;;  %v1745_v8 = vmul.f32 %v1729_v7, %v1633_v63  ;;  %v5018_v11 = vsel %vm1991_vm2, 1.0, %v2007_v18  ;;  %v1822_v34 = vsub.f32 1.0, %v1806_v43 }
 0x2f3   :  { %v1791_v55 = vsel %vm1759_vm10, %v1775_v20, %v1743_v48  ;;  %v1776_v38 = vsub.f32 3.1415927, %v1744_v1  ;;  %v5317_v35 = vclamps-f32 %v5316_v57, 1.0  ;;  %2050 = vadd.xlane.f32.xlu1 %v5018_v11  ;;  %v2081_v39 = vpack.c.bf16 %v5018_v11, %v4993_v24  ;;  %v2209_v48 = vpop.f32.mrb[23].mxu1 }
 0x2f4   :  { %v1807_v13 = vmul.f32 0.31830987, %v1791_v55  ;;  %v1777_v45 = vsub.f32 3.1415927, %v1745_v8  ;;  %v5319_v26 = vclamps-f32 %v5318_v42, 1.0  ;;  %v2008_v62 = vsel %vm1907_vm1, %v1822_v34, 0.0 }
 0x2f5   :  { %vm1760_vm4 = vcmp.lt.f32.partialorder %v5317_v35, 0.0  ;;  %vm1908_vm7 = vcmp.eq.s32.totalorder %v4935_v6, %v4492_v51  ;;  %v5037_v16 = vsel %vm1992_vm0, 1.0, %v2008_v62  ;;  %vm1993_vm8 = vcmp.eq.s32.totalorder %v1969_v23, %v4507_v15  ;;  %v5058_v20 = vpop.f32.mrb[24].mxu1 }
 0x2f6   :  { %vm1761_vm6 = vcmp.lt.f32.partialorder %v5319_v26, 0.0  ;;  %v1823_v61 = vsub.f32 1.0, %v1807_v13  ;;  %v1792_v60 = vsel %vm1760_vm4, %v1776_v38, %v1744_v1  ;;  %2052 = vadd.xlane.f32.xlu0 %v5037_v16  ;;  %vm1909_vm9 = vcmp.eq.s32.totalorder %v1887_v41, %v4492_v51  ;;  %v2222_v54 = vpop.f32.mrb[25].mxu1 }
 0x2f7   :  { %v1808_v33 = vmul.f32 0.31830987, %v1792_v60  ;;  %v1793_v12 = vsel %vm1761_vm6, %v1777_v45, %v1745_v8  ;;  %vm1994_vm3 = vcmp.eq.s32.totalorder %v1972_v5, %v4507_v15  ;;  %vm1910_vm5 = vcmp.eq.s32.totalorder %v1890_v59, %v4492_v51  ;;  %v5060_v41 = vpop.f32.mrb[26].mxu1 }
 0x2f8   :  { %v2009_v50 = vsel %vm1908_vm7, %v1823_v61, 0.0  ;;  %v1809_v58 = vmul.f32 0.31830987, %v1793_v12  ;;  %vm1995_vm12 = vcmp.eq.s32.totalorder %v1975_v31, %v4507_v15  ;;  %v2225_v51 = vpop.f32.mrb[27].mxu1 }
 0x2f9   :  { %v5041_v9 = vsel %vm1993_vm8, 1.0, %v2009_v50  ;;  %v1824_v32 = vsub.f32 1.0, %v1808_v33  ;;  %v5062_v56 = vpop.f32.mrb[28].mxu1 }
 0x2fa   :  { %2054 = vadd.xlane.f32.xlu1 %v5041_v9  ;;  %v2082_v6 = vpack.c.bf16 %v5041_v9, %v5037_v16  ;;  %v1825_v10 = vsub.f32 1.0, %v1809_v58  ;;  %v5064_v15 = vpop.f32.mrb[29].mxu1 }
 0x2fb   :  { %v2010_v23 = vsel %vm1909_vm9, %v1824_v32, 0.0  ;;  %v5066_v44 = vpop.f32.mrb[30].mxu1 }
 0x2fc   :  { %v5050_v14 = vsel %vm1994_vm3, 1.0, %v2010_v23  ;;  %v2011_v7 = vsel %vm1910_vm5, %v1825_v10, 0.0  ;;  %v5068_v43 = vpop.f32.mrb[31].mxu1 }
 0x2fd   :  { %2056 = vadd.xlane.f32.xlu0 %v5050_v14  ;;  %v5053_v22 = vsel %vm1995_vm12, 1.0, %v2011_v7 }
 0x2fe   :  { %2058 = vadd.xlane.f32.xlu1 %v5053_v22  ;;  %v2083_v3 = vpack.c.bf16 %v5053_v22, %v5050_v14 }
 0x349   :  { %v2031_v1 = vpop.xlane.xlu0 %2030 }
 0x34a   :  { %3462 = vrsqrt.f32 %v2031_v1 }
 0x354   :  { %v2029_v63 = vpop.xlane.xlu1 %2028  ;;  %v5070_v55 = vpop.eup %3462 }
 0x355   :  { %3464 = vrsqrt.f32 %v2029_v63  ;;  %v2254_v13 = vmul.f32 %v5070_v55, %v4988_v2 }
 0x357   :  { %v2033_v59 = vpop.xlane.xlu0 %2032 }
 0x358   :  { %3466 = vrsqrt.f32 %v2033_v59 }
 0x35a   :  { %v2035_v18 = vpop.xlane.xlu1 %2034 }
 0x35b   :  { %3468 = vrsqrt.f32 %v2035_v18 }
 0x35e   :  { %v2037_v8 = vpop.xlane.xlu0 %2036 }
 0x35f   :  { %3470 = vrsqrt.f32 %v2037_v8  ;;  %v5074_v38 = vpop.eup %3464 }
 0x360   :  { %v2039_v34 = vpop.xlane.xlu1 %2038  ;;  %v2253_v57 = vmul.f32 %v5074_v38, %v4965_v25 }
 0x361   :  { %3472 = vrsqrt.f32 %v2039_v34 }
 0x362   :  { %v5078_v45 = vpop.eup %3466  ;;  %v2269_v26 = vpack.c.bf16 %v2254_v13, %v2253_v57 }
 0x363   :  { %v2255_v42 = vmul.f32 %v5078_v45, %v4901_v40 }
 0x364   :  { %v2041_v35 = vpop.xlane.xlu0 %2040  ;;  %3080 = vmatprep.subr.bf16.mxu1 %v2269_v26 }
 0x365   :  { %3474 = vrsqrt.f32 %v2041_v35  ;;  %v5082_v61 = vpop.eup %3468  ;;  %3081 = vmatpush3.bf16.msra.mxu1 %v2269_v26 }
 0x366   :  { %v2256_v2 = vmul.f32 %v5082_v61, %v4971_v17 }
 0x367   :  { %v2043_v62 = vpop.xlane.xlu1 %2042 }
 0x368   :  { %3476 = vrsqrt.f32 %v2043_v62  ;;  %v2270_v25 = vpack.c.bf16 %v2256_v2, %v2255_v42 }
 0x369   :  { %v5086_v33 = vpop.eup %3470 }
 0x36a   :  { %v2045_v60 = vpop.xlane.xlu0 %2044  ;;  %v2257_v40 = vmul.f32 %v5086_v33, %v5026_v52  ;;  %3082 = vmatprep.subr.bf16.mxu1 %v2270_v25 }
 0x36b   :  { %3478 = vrsqrt.f32 %v2045_v60  ;;  %v5088_v12 = vpop.eup %3472  ;;  %3083 = vmatpush3.bf16.msra.mxu1 %v2270_v25 }
 0x36c   :  { %v2258_v5 = vmul.f32 %v5088_v12, %v2209_v48 }
 0x36e   :  { %v2271_v58 = vpack.c.bf16 %v2258_v5, %v2257_v40 }
 0x36f   :  { %v2047_v50 = vpop.xlane.xlu1 %2046  ;;  %v5093_v17 = vpop.eup %3474 }
 0x370   :  { %3480 = vrsqrt.f32 %v2047_v50  ;;  %v2259_v31 = vmul.f32 %v5093_v17, %v5002_v19  ;;  %3084 = vmatprep.subr.bf16.mxu1 %v2271_v58 }
 0x371   :  { %3085 = vmatpush3.bf16.msra.mxu1 %v2271_v58 }
 0x372   :  { %v5097_v32 = vpop.eup %3476 }
 0x373   :  { %v2260_v10 = vmul.f32 %v5097_v32, %v5033_v4 }
 0x375   :  { %v5101_v52 = vpop.eup %3478  ;;  %v2272_v48 = vpack.c.bf16 %v2260_v10, %v2259_v31 }
 0x376   :  { %v2261_v23 = vmul.f32 %v5101_v52, %v2222_v54 }
 0x377   :  { %3086 = vmatprep.subr.bf16.mxu1 %v2272_v48 }
 0x378   :  { %3087 = vmatpush3.bf16.msra.mxu1 %v2272_v48 }
 0x37a   :  { %v5104_v7 = vpop.eup %3480 }
 0x37b   :  { %v2262_v63 = vmul.f32 %v5104_v7, %v2225_v51 }
 0x37c   :  { %v2049_v1 = vpop.xlane.xlu0 %2048 }
 0x37d   :  { %3482 = vrsqrt.f32 %v2049_v1  ;;  %v2273_v19 = vpack.c.bf16 %v2262_v63, %v2261_v23 }
 0x37f   :  { %3088 = vmatprep.subr.bf16.mxu1 %v2273_v19 }
 0x380   :  { %v2051_v59 = vpop.xlane.xlu1 %2050  ;;  %3089 = vmatpush3.bf16.msra.mxu1 %v2273_v19 }
 0x381   :  { %3484 = vrsqrt.f32 %v2051_v59 }
 0x383   :  { %v2053_v18 = vpop.xlane.xlu0 %2052 }
 0x384   :  { %3486 = vrsqrt.f32 %v2053_v18 }
 0x387   :  { %v2055_v4 = vpop.xlane.xlu1 %2054  ;;  %v5107_v8 = vpop.eup %3482 }
 0x388   :  { %3488 = vrsqrt.f32 %v2055_v4  ;;  %v2263_v13 = vmul.f32 %v5107_v8, %v5058_v20 }
 0x38a   :  { %v2057_v34 = vpop.xlane.xlu0 %2056 }
 0x38b   :  { %v2059_v54 = vpop.xlane.xlu1 %2058  ;;  %3490 = vrsqrt.f32 %v2057_v34  ;;  %v5111_v51 = vpop.eup %3484 }
 0x38c   :  { %3492 = vrsqrt.f32 %v2059_v54  ;;  %v2264_v57 = vmul.f32 %v5111_v51, %v5060_v41 }
 0x38e   :  { %v5115_v35 = vpop.eup %3486  ;;  %v2274_v42 = vpack.c.bf16 %v2264_v57, %v2263_v13 }
 0x38f   :  { %v2265_v26 = vmul.f32 %v5115_v35, %v5064_v15 }
 0x390   :  { %3090 = vmatprep.subr.bf16.mxu1 %v2274_v42 }
 0x391   :  { %3091 = vmatpush3.bf16.msra.mxu1 %v2274_v42 }
 0x392   :  { %v5119_v62 = vpop.eup %3488 }
 0x393   :  { %v2266_v2 = vmul.f32 %v5119_v62, %v5068_v43 }
 0x395   :  { %v5123_v20 = vpop.eup %3490  ;;  %v2275_v60 = vpack.c.bf16 %v2266_v2, %v2265_v26 }
 0x396   :  { %v5125_v25 = vpop.eup %3492  ;;  %v2267_v41 = vmul.f32 %v5123_v20, %v5062_v56 }
 0x397   :  { %v2268_v40 = vmul.f32 %v5125_v25, %v5066_v44  ;;  %3092 = vmatprep.subr.bf16.mxu1 %v2275_v60 }
 0x398   :  { %3093 = vmatpush3.bf16.msra.mxu1 %v2275_v60 }
 0x399   :  { %v2276_v15 = vpack.c.bf16 %v2268_v40, %v2267_v41 }
 0x39b   :  { %3094 = vmatprep.subr.bf16.mxu1 %v2276_v15 }
 0x39c   :  { %3095 = vmatpush3.bf16.msra.mxu1 %v2276_v15 }
 0x39f   :  { %3097 = vmatmul.mubr.bf16.vlgmr.msra.gmra.mrb[32].mxu1 %v2077_v53 }
 0x3a0   :  { %3100 = vmatprep.mubr.bf16.mxu1 %v2078_v28 }
 0x3a7   :  { %3101 = vmatmul.mubr.bf16.gmra.mrb[36].mxu1 %v2079_v49 }
 0x3a8   :  { %3104 = vmatprep.mubr.bf16.mxu1 %v2080_v37 }
 0x3af   :  { %3105 = vmatmul.mubr.bf16.gmra.mrb[40].mxu1 %v2081_v39 }
 0x3b0   :  { %3108 = vmatprep.mubr.bf16.mxu1 %v2082_v6 }
 0x3b7   :  { %3109 = vmatmul.mubr.bf16.gmra.mrb[44].mxu1 %v2083_v3 }
 0x472   :  { %v3098_v27 = vpop.f32.mrb[32].mxu1 }
 0x473   :  { %v2376_v53 = vmul.f32 %v5078_v45, %v3098_v27  ;;  %v2311_v46 = vpop.f32.mrb[33].mxu1 }
 0x474   :  { %v2374_v30 = vmul.f32 %v5074_v38, %v2311_v46  ;;  %v3099_v28 = vpop.f32.mrb[34].mxu1 }
 0x475   :  { %v2399_v47 = vadd.f32 %v5155_v36, %v2376_v53  ;;  %v2377_v29 = vmul.f32 %v5082_v61, %v3099_v28  ;;  %v2314_v49 = vpop.f32.mrb[35].mxu1 }
 0x476   :  { %v2397_v21 = vadd.f32 %v5155_v36, %v2374_v30  ;;  %v2375_v0 = vmul.f32 %v5070_v55, %v2314_v49 }
 0x477   :  { %2415 = vst [vmem:[#allocation2 + $0x10] sm:$0xff] %v2399_v47  ;;  %v2400_v37 = vadd.f32 %v5155_v36, %v2377_v29 }
 0x478   :  { %2413 = vst [vmem:[#allocation2] sm:$0xff] %v2397_v21  ;;  %v2398_v24 = vadd.f32 %v5155_v36, %v2375_v0 }
 0x479   :  { %2416 = vst [vmem:[#allocation2 + $0x18] sm:$0xff] %v2400_v37 }
 0x47a   :  { %2414 = vst [vmem:[#allocation2 + $0x8] sm:$0xff] %v2398_v24  ;;  %v3102_v11 = vpop.f32.mrb[36].mxu1 }
 0x47b   :  { %v2380_v39 = vmul.f32 %v5093_v17, %v3102_v11  ;;  %v2327_v16 = vpop.f32.mrb[37].mxu1 }
 0x47c   :  { %v2378_v9 = vmul.f32 %v5086_v33, %v2327_v16  ;;  %v3103_v6 = vpop.f32.mrb[38].mxu1 }
 0x47d   :  { %v2403_v14 = vadd.f32 %v5155_v36, %v2380_v39  ;;  %v2381_v22 = vmul.f32 %v5097_v32, %v3103_v6  ;;  %v2330_v3 = vpop.f32.mrb[39].mxu1 }
 0x47e   :  { %v2401_v56 = vadd.f32 %v5155_v36, %v2378_v9  ;;  %v2379_v44 = vmul.f32 %v5088_v12, %v2330_v3 }
 0x47f   :  { %2419 = vst [vmem:[#allocation2 + $0x30] sm:$0xff] %v2403_v14  ;;  %v2404_v43 = vadd.f32 %v5155_v36, %v2381_v22 }
 0x480   :  { %2417 = vst [vmem:[#allocation2 + $0x20] sm:$0xff] %v2401_v56  ;;  %v2402_v55 = vadd.f32 %v5155_v36, %v2379_v44 }
 0x481   :  { %2420 = vst [vmem:[#allocation2 + $0x38] sm:$0xff] %v2404_v43 }
 0x482   :  { %2418 = vst [vmem:[#allocation2 + $0x28] sm:$0xff] %v2402_v55  ;;  %v3106_v38 = vpop.f32.mrb[40].mxu1 }
 0x483   :  { %v2384_v45 = vmul.f32 %v5107_v8, %v3106_v38  ;;  %v2343_v61 = vpop.f32.mrb[41].mxu1 }
 0x484   :  { %v2382_v33 = vmul.f32 %v5101_v52, %v2343_v61  ;;  %v3107_v5 = vpop.f32.mrb[42].mxu1 }
 0x485   :  { %v2407_v50 = vadd.f32 %v5155_v36, %v2384_v45  ;;  %v2385_v58 = vmul.f32 %v5111_v51, %v3107_v5  ;;  %v2346_v12 = vpop.f32.mrb[43].mxu1 }
 0x486   :  { %v2405_v17 = vadd.f32 %v5155_v36, %v2382_v33  ;;  %v2383_v31 = vmul.f32 %v5104_v7, %v2346_v12 }
 0x487   :  { %2423 = vst [vmem:[#allocation2 + $0x50] sm:$0xff] %v2407_v50  ;;  %v2408_v32 = vadd.f32 %v5155_v36, %v2385_v58 }
 0x488   :  { %2421 = vst [vmem:[#allocation2 + $0x40] sm:$0xff] %v2405_v17  ;;  %v2406_v10 = vadd.f32 %v5155_v36, %v2383_v31 }
 0x489   :  { %2424 = vst [vmem:[#allocation2 + $0x58] sm:$0xff] %v2408_v32 }
 0x48a   :  { %2422 = vst [vmem:[#allocation2 + $0x48] sm:$0xff] %v2406_v10  ;;  %v3110_v48 = vpop.f32.mrb[44].mxu1 }
 0x48b   :  { %v2388_v52 = vmul.f32 %v5123_v20, %v3110_v48  ;;  %v2359_v23 = vpop.f32.mrb[45].mxu1 }
 0x48c   :  { %v2386_v1 = vmul.f32 %v5115_v35, %v2359_v23  ;;  %v3111_v63 = vpop.f32.mrb[46].mxu1 }
 0x48d   :  { %v2411_v19 = vadd.f32 %v5155_v36, %v2388_v52  ;;  %v2389_v59 = vmul.f32 %v5125_v25, %v3111_v63  ;;  %v2362_v7 = vpop.f32.mrb[47].mxu1 }
 0x48e   :  { %v2409_v18 = vadd.f32 %v5155_v36, %v2386_v1  ;;  %v2387_v4 = vmul.f32 %v5119_v62, %v2362_v7 }
 0x48f   :  { %2427 = vst [vmem:[#allocation2 + $0x70] sm:$0xff] %v2411_v19  ;;  %v2412_v8 = vadd.f32 %v5155_v36, %v2389_v59 }
 0x490   :  { %2425 = vst [vmem:[#allocation2 + $0x60] sm:$0xff] %v2409_v18  ;;  %v2410_v34 = vadd.f32 %v5155_v36, %v2387_v4 }
 0x491   :  { %2428 = vst [vmem:[#allocation2 + $0x78] sm:$0xff] %v2412_v8 }
 0x492   :  { %2426 = vst [vmem:[#allocation2 + $0x68] sm:$0xff] %v2410_v34 }
 0x493   :  { %3520 = shalt.err (!%p3517_p4)
}
 0x494   :  { %s3521_s29 = scalar_lea.hbm %s5208_s7, 2048 }
 0x495   :  { %p3522_p5 = scmp.ne.s32.totalorder %s5208_s7, %s3521_s29  ;;  %p3525_p6 = scmp.lt.u32.totalorder %s3521_s29, %s5208_s7 }
 0x497   :  { %p3527_p7 = pnand %p3525_p6, %p3522_p5 }
 0x499   :  { %3530 = shalt.err (!%p3527_p7)
}
 0x49a   :  { %s3535_s4 = smov 128   ;;  %s3536_s10 = smov 8  }
 0x49b   :  { %2440 = dma.vmem_to_hbm [thread:$0]  %s2435_s25, 2048, %s5208_s7, [#allocation3], %s3535_s4, %s3535_s4, %s3536_s10  }
 0x49c   :  { %3531 = dma.done.wait [#allocation3], 2048  }
 0x49d   :  { %3532 = vsyncadd [#allocation3], 4294965248 }
 0x49e   :  { %2444 = vsyncpa [#allocation3], 1 }

</bundles_post_ra>
